<compile_context>
chip_gen: v7x
topology: tpu7x:2x2x1
jax: 0.10.0
libtpu: 0.0.40
codegen_flags: <defaults>
</compile_context>

<pallas_src>
import functools
import math

import jax
import jax.numpy as jnp
from jax import lax
from jax.experimental import pallas as pl
from jax.experimental.pallas import tpu as pltpu


# ----------------------------- helpers (traced inside kernels) -----------------------------

def _layer_norm(x, g, b, eps=1e-5):
    mu = jnp.mean(x, axis=-1, keepdims=True)
    var = jnp.mean((x - mu) ** 2, axis=-1, keepdims=True)
    return (x - mu) * lax.rsqrt(var + eps) * g + b


def _gelu_new(x):
    # GPT-2 "gelu_new" (tanh approximation)
    return 0.5 * x * (1.0 + jnp.tanh(0.7978845608028654 * (x + 0.044715 * x * x * x)))


# ----------------------------- Pallas kernels -----------------------------

def blocks_kernel(x_ref, pad_ref,
                  ln1g, ln1b, wqkv, bqkv, wproj, bproj,
                  ln2g, ln2b, wfc, bfc, wout, bout,
                  lnfg, lnfb,
                  o_ref, res_ref, attn_ref,
                  *, n_heads, head_dim, ffn_tile):
    """One grid step = (batch block b, layer l). The f32 residual lives in the res_ref
    VMEM scratch (persists across the layer axis); the only HBM output is the
    final-LayerNorm'd bf16 hidden state written at l == L-1."""
    l = pl.program_id(1)
    Bb, S, H = res_ref.shape
    FF = wfc.shape[-1]
    T = Bb * S
    bf16 = jnp.bfloat16

    @pl.when(l == 0)
    def _init():
        res_ref[...] = x_ref[...]        # seed residual stream with the embeddings

    x = res_ref[...].reshape(T, H)       # f32 residual, flattened over the batch block

    # Causal mask generated in-kernel (cheap VPU work that hides under the MXU)
    # instead of a (B,S,S) f32 bias streamed from HBM.
    not_causal = (lax.broadcasted_iota(jnp.int32, (S, S), 0)
                  < lax.broadcasted_iota(jnp.int32, (S, S), 1))

    # ---- attention ----
    h = _layer_norm(x, ln1g[0], ln1b[0]).astype(bf16)
    qkv = (jnp.dot(h, wqkv[0], preferred_element_type=jnp.float32)
           + bqkv[0]).astype(bf16)       # (T, 3H); 1/sqrt(dH) pre-folded into the Q columns
    qkv = qkv.reshape(Bb, S, 3 * H)

    for bb in range(Bb):
        pad_row = pad_ref[bb]            # (1, S) additive key-padding bias
        qkv_b = qkv[bb]                  # (S, 3H) bf16
        for hh in range(n_heads):
            lo = hh * head_dim
            q = qkv_b[:, lo:lo + head_dim]
            k = qkv_b[:, H + lo:H + lo + head_dim]
            v = qkv_b[:, 2 * H + lo:2 * H + lo + head_dim]
            s = lax.dot_general(q, k, (((1,), (1,)), ((), ())),
                                preferred_element_type=jnp.float32)      # (S, S)
            s = jnp.where(not_causal, -1e9, s + pad_row)
            m = jnp.max(s, axis=-1, keepdims=True)
            p = jnp.exp(s - m)
            denom = jnp.sum(p, axis=-1, keepdims=True)
            o = jnp.dot(p.astype(bf16), v, preferred_element_type=jnp.float32)
            # normalize AFTER the AV matmul: (S, dH) multiply instead of (S, S)
            attn_ref[bb, :, lo:lo + head_dim] = o * pl.reciprocal(denom, approx=True)
    # NOTE: for S >~ 1K this head loop should be replaced by an online-softmax KV-tile
    # (flash-style) loop so scores stay (S, Tk) instead of full (S, S).

    attn = jnp.dot(attn_ref[...].reshape(T, H).astype(bf16), wproj[0],
                   preferred_element_type=jnp.float32) + bproj[0]
    x = x + attn

    # ---- MLP, K-tiled over the FFN dim so the f32 intermediate is (T, ffn_tile), not (T, 4H)
    h2 = _layer_norm(x, ln2g[0], ln2b[0]).astype(bf16)
    ff = jnp.zeros((T, H), jnp.float32)
    for k0 in range(0, FF, ffn_tile):
        k1 = min(FF, k0 + ffn_tile)
        part = (jnp.dot(h2, wfc[0, :, k0:k1], preferred_element_type=jnp.float32)
                + bfc[0, :, k0:k1])
        part = _gelu_new(part).astype(bf16)
        ff = ff + jnp.dot(part, wout[0, k0:k1, :], preferred_element_type=jnp.float32)
    x = x + ff + bout[0]

    res_ref[...] = x.reshape(Bb, S, H)

    # Final LayerNorm hoisted out of the LM head: done once per sequence, emitted bf16.
    @pl.when(l == pl.num_programs(1) - 1)
    def _finalize():
        o_ref[...] = _layer_norm(x, lnfg[...], lnfb[...]).astype(bf16).reshape(Bb, S, H)


def lmhead_kernel(xn_ref, wte_t_ref, o_ref):
    # xn_ref: (Bb,S,H) bf16, already final-LayerNorm'd; wte_t_ref: (H,TN) bf16 vocab tile.
    Bb, S, H = xn_ref.shape
    h = xn_ref[...].reshape(Bb * S, H)
    o = jnp.dot(h, wte_t_ref[...], preferred_element_type=jnp.float32)
    o_ref[...] = o.reshape(Bb, S, -1).astype(o_ref.dtype)


# ----------------------------- tiling / limit heuristics -----------------------------

def _vmem_limit_bytes():
    # ~75% of physical VMEM: ~96 MiB on v5e/v6e (128 MiB), ~48 MiB on v7x (64 MiB).
    try:
        cap = int(pltpu.get_tpu_info().vmem_capacity_bytes)
    except Exception:
        cap = 64 * 1024 * 1024
    return int(min(max(cap * 3 // 4, 32 * 1024 * 1024), 112 * 1024 * 1024))


def _pick_batch_block(B):
    # reuse each layer-weight DMA across Bb sequences, but keep >=2 parallel grid steps
    for bb in (4, 2):
        if B % bb == 0 and B // bb >= 2:
            return bb
    return 1


def _pick_vocab_tile(Vp, H, S, Bb, vmem_limit, out_bytes=4):
    # Largest lane-dense (multiple-of-128) vocab tile whose double-buffered bf16 weight
    # tile + output block fit half the VMEM budget. Never falls back to TN=V.
    budget = vmem_limit // 2
    per_col = 2 * (H * 2) + 2 * (Bb * S * out_bytes)
    tn = (budget // max(per_col, 1)) // 128 * 128
    return int(max(128, min(tn, 8192, Vp)))


# ----------------------------- forward wrapper -----------------------------

def custom_gpt_forward(params, input_ids, times, attention_mask=None,
                       logits_dtype=jnp.float32):
    cfg = params['cfg']
    B, S = input_ids.shape
    H, V, nH, L = cfg['hidden'], cfg['vocab'], cfg['heads'], cfg['layers']
    dH = H // nH
    FF = 4 * H
    Bb = _pick_batch_block(B)
    vmem_limit = _vmem_limit_bytes()

    # ---- embeddings: gather + time-linear + wpe (pure elementwise glue; XLA fuses) ----
    tok = jnp.take(params['wte'], input_ids, axis=0)                       # (B,S,H) f32
    time_emb = times.astype(jnp.float32)[..., None] * params['time_w'] + params['time_b']
    x = tok + time_emb + params['wpe'][:S][None]                           # (B,S,H)

    # ---- additive key-padding row only; the causal mask is generated in-kernel ----
    if attention_mask is None:
        pad = jnp.zeros((B, 1, S), jnp.float32)
    else:
        pad = jnp.where(attention_mask > 0, 0.0, -1e9).astype(jnp.float32)[:, None, :]

    per_layer = lambda *shape: pl.BlockSpec((1,) + shape, lambda b, l: (l, 0, 0))
    batch3 = lambda *shape: pl.BlockSpec((Bb,) + shape, lambda b, l: (b, 0, 0))
    const2 = pl.BlockSpec((1, H), lambda b, l: (0, 0))

    # ---- fused transformer stack: one pallas_call, grid (batch block, layer) ----
    xn = pl.pallas_call(
        functools.partial(blocks_kernel, n_heads=nH, head_dim=dH,
                          ffn_tile=min(FF, 1024)),
        out_shape=jax.ShapeDtypeStruct((B, S, H), jnp.bfloat16),
        grid=(B // Bb, L),
        in_specs=[
            batch3(S, H),            # embeddings (read at l == 0)
            batch3(1, S),            # key-padding additive row
            per_layer(1, H), per_layer(1, H),            # ln1
            per_layer(H, 3 * H), per_layer(1, 3 * H),    # qkv (bf16, Q-scale folded)
            per_layer(H, H), per_layer(1, H),            # attn out proj (bf16)
            per_layer(1, H), per_layer(1, H),            # ln2
            per_layer(H, FF), per_layer(1, FF),          # mlp fc (bf16)
            per_layer(FF, H), per_layer(1, H),           # mlp out (bf16)
            const2, const2,                              # final ln (applied at l == L-1)
        ],
        out_specs=pl.BlockSpec((Bb, S, H), lambda b, l: (b, 0, 0)),
        scratch_shapes=[pltpu.VMEM((Bb, S, H), jnp.float32),   # resident residual stream
                        pltpu.VMEM((Bb, S, H), jnp.float32)],  # per-head attention output
        compiler_params=pltpu.CompilerParams(
            dimension_semantics=("parallel", "arbitrary"),
            vmem_limit_bytes=vmem_limit),
    )(x, pad,
      params['ln1_g'], params['ln1_b'], params['w_qkv'], params['b_qkv'],
      params['w_proj'], params['b_proj'], params['ln2_g'], params['ln2_b'],
      params['w_fc'], params['b_fc'], params['w_out'], params['b_out'],
      params['lnf_g'], params['lnf_b'])

    # ---- tied LM head over the padded, lane-dense vocab (wte^T padded/cast once at init) ----
    Vp = params['wte_t'].shape[1]
    out_bytes = jnp.dtype(logits_dtype).itemsize
    TN = _pick_vocab_tile(Vp, H, S, Bb, vmem_limit, out_bytes)
    logits = pl.pallas_call(
        lmhead_kernel,
        out_shape=jax.ShapeDtypeStruct((B, S, Vp), logits_dtype),
        grid=(B // Bb, pl.cdiv(Vp, TN)),
        in_specs=[
            pl.BlockSpec((Bb, S, H), lambda b, j: (b, 0, 0)),
            pl.BlockSpec((H, TN), lambda b, j: (0, j)),
        ],
        out_specs=pl.BlockSpec((Bb, S, TN), lambda b, j: (b, 0, j)),
        compiler_params=pltpu.CompilerParams(
            dimension_semantics=("parallel", "parallel"),
            vmem_limit_bytes=vmem_limit),
    )(xn, params['wte_t'])

    return logits[..., :V]


# ----------------------------- deterministic parameter init -----------------------------

def init_params(key, vocab=64, hidden=32, n_layers=2, n_heads=4, max_pos=16):
    std = 0.02
    ks = iter(jax.random.split(key, 8))
    nrm = lambda shape: std * jax.random.normal(next(ks), shape, jnp.float32)
    ones = lambda shape: jnp.ones(shape, jnp.float32)
    zeros = lambda shape: jnp.zeros(shape, jnp.float32)
    L, H = n_layers, hidden
    dH = H // n_heads

    wte = nrm((vocab, H))                                    # f32 embedding table (tied)
    Vp = ((vocab + 127) // 128) * 128                        # lane-dense padded vocab
    wte_t = jnp.zeros((H, Vp), jnp.bfloat16).at[:, :vocab].set(wte.T.astype(jnp.bfloat16))

    # Fold 1/sqrt(dH) into the Q columns of w_qkv / b_qkv once at parameter build time.
    w_qkv = nrm((L, H, 3 * H))
    w_qkv = w_qkv.at[:, :, :H].multiply(1.0 / math.sqrt(dH))
    b_qkv = zeros((L, 1, 3 * H))
    b_qkv = b_qkv.at[:, :, :H].multiply(1.0 / math.sqrt(dH))

    return dict(
        cfg=dict(vocab=vocab, hidden=H, heads=n_heads, layers=L),
        wte=wte,
        wte_t=wte_t,                                          # tied head: padded/T/bf16 ONCE
        wpe=nrm((max_pos, H)),
        time_w=nrm((1, H)),                                   # nn.Linear(1, H) weight row
        time_b=zeros((1, H)),
        # combine_layer (hidden*2 -> hidden) exists in __init__ but is unused in forward().
        lnf_g=ones((1, H)), lnf_b=zeros((1, H)),
        # per-layer params stacked along a leading L axis; matmul weights stored bf16
        ln1_g=ones((L, 1, H)), ln1_b=zeros((L, 1, H)),
        w_qkv=w_qkv.astype(jnp.bfloat16), b_qkv=b_qkv,
        w_proj=nrm((L, H, H)).astype(jnp.bfloat16), b_proj=zeros((L, 1, H)),
        ln2_g=ones((L, 1, H)), ln2_b=zeros((L, 1, H)),
        w_fc=nrm((L, H, 4 * H)).astype(jnp.bfloat16), b_fc=zeros((L, 1, 4 * H)),
        w_out=nrm((L, 4 * H, H)).astype(jnp.bfloat16), b_out=zeros((L, 1, H)),
    )


# ----------------------------- pure-JAX reference (tolerance check) -----------------------------

def reference_forward(params, input_ids, times, attention_mask=None):
    cfg = params['cfg']
    H, V, nH, L = cfg['hidden'], cfg['vocab'], cfg['heads'], cfg['layers']
    dH = H // nH
    B, S = input_ids.shape
    f32 = lambda a: a.astype(jnp.float32)

    tok = jnp.take(params['wte'], input_ids, axis=0)
    temb = times.astype(jnp.float32)[..., None] * params['time_w'] + params['time_b']
    x = tok + temb + params['wpe'][:S][None]

    causal = jnp.arange(S)[:, None] >= jnp.arange(S)[None, :]
    if attention_mask is None:
        keep = jnp.broadcast_to(causal[None], (B, S, S))
    else:
        keep = causal[None] & (attention_mask > 0)[:, None, :]
    bias = jnp.where(keep, 0.0, -1e9)[:, None]                # (B,1,S,S)

    for l in range(L):
        h = _layer_norm(x, params['ln1_g'][l], params['ln1_b'][l])
        qkv = h @ f32(params['w_qkv'][l]) + params['b_qkv'][l]
        q, k, v = jnp.split(qkv, 3, axis=-1)
        q = q.reshape(B, S, nH, dH).transpose(0, 2, 1, 3)
        k = k.reshape(B, S, nH, dH).transpose(0, 2, 1, 3)
        v = v.reshape(B, S, nH, dH).transpose(0, 2, 1, 3)
        s = jnp.einsum('bhqd,bhkd->bhqk', q, k) + bias
        p = jax.nn.softmax(s, axis=-1)
        o = jnp.einsum('bhqk,bhkd->bhqd', p, v).transpose(0, 2, 1, 3).reshape(B, S, H)
        x = x + o @ f32(params['w_proj'][l]) + params['b_proj'][l]
        h2 = _layer_norm(x, params['ln2_g'][l], params['ln2_b'][l])
        ff = _gelu_new(h2 @ f32(params['w_fc'][l]) + params['b_fc'][l])
        x = x + ff @ f32(params['w_out'][l]) + params['b_out'][l]
    x = _layer_norm(x, params['lnf_g'], params['lnf_b'])
    return x @ f32(params['wte_t'])[:, :V]


# ----------------------------- main -----------------------------

if __name__ == "__main__":
    B, S, H, V, nH, L = 4, 8, 32, 64, 4, 2
    key = jax.random.PRNGKey(0)
    kp, ki, kt = jax.random.split(key, 3)

    params = init_params(kp, vocab=V, hidden=H, n_layers=L, n_heads=nH, max_pos=16)

    input_ids = jax.random.randint(ki, (B, S), 0, V, dtype=jnp.int32)
    times = jax.random.uniform(kt, (B, S), dtype=jnp.float32)
    attention_mask = jnp.ones((B, S), jnp.float32)

    logits = custom_gpt_forward(params, input_ids, times, attention_mask)
    logits = jax.block_until_ready(logits)

    assert logits.shape == (B, S, V), logits.shape
    assert logits.dtype == jnp.float32
    assert bool(jnp.all(jnp.isfinite(logits)))

    ref = reference_forward(params, input_ids, times, attention_mask)
    assert bool(jnp.allclose(logits, ref, atol=3e-2, rtol=3e-2)), \
        float(jnp.max(jnp.abs(logits - ref)))

    print("KERNEL_OK")
</pallas_src>

<mosaic_0001>
module attributes {stable_mosaic.version = 11 : i64} {
  func.func @blocks_kernel(%arg0: i32, %arg1: i32, %arg2: memref<2x8x32xf32, #tpu.memory_space<vmem>>, %arg3: memref<2x1x8xf32, #tpu.memory_space<vmem>>, %arg4: memref<1x1x32xf32, #tpu.memory_space<vmem>>, %arg5: memref<1x1x32xf32, #tpu.memory_space<vmem>>, %arg6: memref<1x32x96xbf16, #tpu.memory_space<vmem>>, %arg7: memref<1x1x96xf32, #tpu.memory_space<vmem>>, %arg8: memref<1x32x32xbf16, #tpu.memory_space<vmem>>, %arg9: memref<1x1x32xf32, #tpu.memory_space<vmem>>, %arg10: memref<1x1x32xf32, #tpu.memory_space<vmem>>, %arg11: memref<1x1x32xf32, #tpu.memory_space<vmem>>, %arg12: memref<1x32x128xbf16, #tpu.memory_space<vmem>>, %arg13: memref<1x1x128xf32, #tpu.memory_space<vmem>>, %arg14: memref<1x128x32xbf16, #tpu.memory_space<vmem>>, %arg15: memref<1x1x32xf32, #tpu.memory_space<vmem>>, %arg16: memref<1x32xf32, #tpu.memory_space<vmem>>, %arg17: memref<1x32xf32, #tpu.memory_space<vmem>>, %arg18: memref<2x8x32xbf16, #tpu.memory_space<vmem>>, %arg19: memref<2x8x32xf32, #tpu.memory_space<vmem>>, %arg20: memref<2x8x32xf32, #tpu.memory_space<vmem>>) attributes {dimension_semantics = [#tpu.dimension_semantics<parallel>, #tpu.dimension_semantics<arbitrary>], iteration_bounds = array<i64: 2, 2>, scalar_prefetch = 0 : i64, scratch_operands = 2 : i64, tpu.core_type = #tpu.core_type<tc>, window_params = [{transform_indices = @transform_0, window_bounds = array<i64: 2, 8, 32>}, {transform_indices = @transform_1, window_bounds = array<i64: 2, 1, 8>}, {transform_indices = @transform_2, window_bounds = array<i64: 1, 1, 32>}, {transform_indices = @transform_3, window_bounds = array<i64: 1, 1, 32>}, {transform_indices = @transform_4, window_bounds = array<i64: 1, 32, 96>}, {transform_indices = @transform_5, window_bounds = array<i64: 1, 1, 96>}, {transform_indices = @transform_6, window_bounds = array<i64: 1, 32, 32>}, {transform_indices = @transform_7, window_bounds = array<i64: 1, 1, 32>}, {transform_indices = @transform_8, window_bounds = array<i64: 1, 1, 32>}, {transform_indices = @transform_9, window_bounds = array<i64: 1, 1, 32>}, {transform_indices = @transform_10, window_bounds = array<i64: 1, 32, 128>}, {transform_indices = @transform_11, window_bounds = array<i64: 1, 1, 128>}, {transform_indices = @transform_12, window_bounds = array<i64: 1, 128, 32>}, {transform_indices = @transform_13, window_bounds = array<i64: 1, 1, 32>}, {pipeline_mode = #tpu.pipeline_mode<synchronous>, transform_indices = @transform_14, window_bounds = array<i64: 1, 32>}, {pipeline_mode = #tpu.pipeline_mode<synchronous>, transform_indices = @transform_15, window_bounds = array<i64: 1, 32>}, {transform_indices = @transform_16, window_bounds = array<i64: 2, 8, 32>}]} {
    %c0_i32 = arith.constant 0 : i32
    %0 = arith.cmpi eq, %arg1, %c0_i32 : i32
    %1 = arith.extui %0 : i1 to i32
    %c0_i32_0 = arith.constant 0 : i32
    %2 = arith.cmpi ne, %1, %c0_i32_0 : i32
    scf.if %2 {
      %c0_130 = arith.constant 0 : index
      %c0_131 = arith.constant 0 : index
      %c0_132 = arith.constant 0 : index
      %310 = vector.load %arg2[%c0_130, %c0_131, %c0_132] : memref<2x8x32xf32, #tpu.memory_space<vmem>>, vector<2x8x32xf32>
      %c0_133 = arith.constant 0 : index
      %c0_134 = arith.constant 0 : index
      %c0_135 = arith.constant 0 : index
      %311 = vector.load %arg19[%c0_133, %c0_134, %c0_135] : memref<2x8x32xf32, #tpu.memory_space<vmem>>, vector<2x8x32xf32>
      tpu.vector_store %arg19[%c0_133, %c0_134, %c0_135], %310 {strides = array<i32>} : memref<2x8x32xf32, #tpu.memory_space<vmem>>, vector<2x8x32xf32>,
    } else {
    }
    %c0 = arith.constant 0 : index
    %c0_1 = arith.constant 0 : index
    %c0_2 = arith.constant 0 : index
    %3 = vector.load %arg19[%c0, %c0_1, %c0_2] : memref<2x8x32xf32, #tpu.memory_space<vmem>>, vector<2x8x32xf32>
    %4 = vector.shape_cast %3 : vector<2x8x32xf32> to vector<16x32xf32>
    %5 = tpu.iota {dimensions = array<i32: 0>} : vector<8x8xi32>
    %6 = tpu.iota {dimensions = array<i32: 1>} : vector<8x8xi32>
    %7 = arith.cmpi slt, %5, %6 : vector<8x8xi32>
    %c0_3 = arith.constant 0 : index
    %c0_4 = arith.constant 0 : index
    %c0_5 = arith.constant 0 : index
    %8 = vector.load %arg4[%c0_3, %c0_4, %c0_5] : memref<1x1x32xf32, #tpu.memory_space<vmem>>, vector<1x1x32xf32>
    %9 = vector.shape_cast %8 : vector<1x1x32xf32> to vector<1x32xf32>
    %c0_6 = arith.constant 0 : index
    %c0_7 = arith.constant 0 : index
    %c0_8 = arith.constant 0 : index
    %10 = vector.load %arg5[%c0_6, %c0_7, %c0_8] : memref<1x1x32xf32, #tpu.memory_space<vmem>>, vector<1x1x32xf32>
    %11 = vector.shape_cast %10 : vector<1x1x32xf32> to vector<1x32xf32>
    %cst = arith.constant dense<0.000000e+00> : vector<16xf32>
    %12 = vector.multi_reduction <add>, %4, %cst [1] : vector<16x32xf32> to vector<16xf32>
    %13 = vector.shape_cast %12 : vector<16xf32> to vector<16x1xf32>
    %cst_9 = arith.constant 3.200000e+01 : f32
    %14 = vector.broadcast %cst_9 : f32 to vector<16x1xf32>
    %15 = arith.divf %13, %14 : vector<16x1xf32>
    %16 = vector.broadcast %15 : vector<16x1xf32> to vector<16x32xf32>
    %17 = arith.subf %4, %16 : vector<16x32xf32>
    %18 = arith.mulf %17, %17 : vector<16x32xf32>
    %cst_10 = arith.constant dense<0.000000e+00> : vector<16xf32>
    %19 = vector.multi_reduction <add>, %18, %cst_10 [1] : vector<16x32xf32> to vector<16xf32>
    %20 = vector.shape_cast %19 : vector<16xf32> to vector<16x1xf32>
    %cst_11 = arith.constant 3.200000e+01 : f32
    %21 = vector.broadcast %cst_11 : f32 to vector<16x1xf32>
    %22 = arith.divf %20, %21 : vector<16x1xf32>
    %23 = vector.broadcast %15 : vector<16x1xf32> to vector<16x32xf32>
    %24 = arith.subf %4, %23 : vector<16x32xf32>
    %cst_12 = arith.constant 9.99999974E-6 : f32
    %25 = vector.broadcast %cst_12 : f32 to vector<16x1xf32>
    %26 = arith.addf %22, %25 : vector<16x1xf32>
    %27 = math.rsqrt %26 : vector<16x1xf32>
    %28 = vector.broadcast %27 : vector<16x1xf32> to vector<16x32xf32>
    %29 = arith.mulf %24, %28 : vector<16x32xf32>
    %30 = vector.broadcast %9 : vector<1x32xf32> to vector<16x32xf32>
    %31 = arith.mulf %29, %30 : vector<16x32xf32>
    %32 = vector.broadcast %11 : vector<1x32xf32> to vector<16x32xf32>
    %33 = arith.addf %31, %32 : vector<16x32xf32>
    %34 = arith.truncf %33 : vector<16x32xf32> to vector<16x32xbf16>
    %c0_13 = arith.constant 0 : index
    %c0_14 = arith.constant 0 : index
    %c0_15 = arith.constant 0 : index
    %35 = vector.load %arg6[%c0_13, %c0_14, %c0_15] : memref<1x32x96xbf16, #tpu.memory_space<vmem>>, vector<1x32x96xbf16>
    %36 = vector.shape_cast %35 : vector<1x32x96xbf16> to vector<32x96xbf16>
    %cst_16 = arith.constant dense<0.000000e+00> : vector<16x96xf32>
    %37 = tpu.matmul %34, %36, %cst_16 {dimension_numbers = #tpu.dot_dimension_numbers<[1], [0], [0], [1], [0, 0, 1, 1], [], []>} : vector<16x32xbf16>, vector<32x96xbf16>, vector<16x96xf32> -> vector<16x96xf32>
    %c0_17 = arith.constant 0 : index
    %c0_18 = arith.constant 0 : index
    %c0_19 = arith.constant 0 : index
    %38 = vector.load %arg7[%c0_17, %c0_18, %c0_19] : memref<1x1x96xf32, #tpu.memory_space<vmem>>, vector<1x1x96xf32>
    %39 = vector.shape_cast %38 : vector<1x1x96xf32> to vector<1x96xf32>
    %40 = vector.broadcast %39 : vector<1x96xf32> to vector<16x96xf32>
    %41 = arith.addf %37, %40 : vector<16x96xf32>
    %42 = arith.truncf %41 : vector<16x96xf32> to vector<16x96xbf16>
    %43 = vector.shape_cast %42 : vector<16x96xbf16> to vector<2x8x96xbf16>
    %c0_20 = arith.constant 0 : index
    %c0_21 = arith.constant 0 : index
    %c0_22 = arith.constant 0 : index
    %44 = vector.load %arg3[%c0_20, %c0_21, %c0_22] : memref<2x1x8xf32, #tpu.memory_space<vmem>>, vector<1x1x8xf32>
    %45 = vector.shape_cast %44 : vector<1x1x8xf32> to vector<1x8xf32>
    %46 = vector.extract_strided_slice %43 {offsets = [0, 0, 0], sizes = [1, 8, 96], strides = [1, 1, 1]} : vector<2x8x96xbf16> to vector<1x8x96xbf16>
    %47 = vector.shape_cast %46 : vector<1x8x96xbf16> to vector<8x96xbf16>
    %48 = vector.extract_strided_slice %47 {offsets = [0, 0], sizes = [8, 8], strides = [1, 1]} : vector<8x96xbf16> to vector<8x8xbf16>
    %49 = vector.extract_strided_slice %47 {offsets = [0, 32], sizes = [8, 8], strides = [1, 1]} : vector<8x96xbf16> to vector<8x8xbf16>
    %50 = vector.extract_strided_slice %47 {offsets = [0, 64], sizes = [8, 8], strides = [1, 1]} : vector<8x96xbf16> to vector<8x8xbf16>
    %cst_23 = arith.constant dense<0.000000e+00> : vector<8x8xf32>
    %51 = tpu.matmul %48, %49, %cst_23 {dimension_numbers = #tpu.dot_dimension_numbers<[1], [1], [0], [0], [0, 0, 1, 0], [], []>} : vector<8x8xbf16>, vector<8x8xbf16>, vector<8x8xf32> -> vector<8x8xf32>
    %52 = vector.broadcast %45 : vector<1x8xf32> to vector<8x8xf32>
    %53 = arith.addf %51, %52 : vector<8x8xf32>
    %cst_24 = arith.constant -1.000000e+09 : f32
    %54 = vector.broadcast %cst_24 : f32 to vector<8x8xf32>
    %55 = arith.select %7, %54, %53 : vector<8x8xi1>, vector<8x8xf32>
    %cst_25 = arith.constant dense<0xFF800000> : vector<8xf32>
    %56 = vector.multi_reduction <maximumf>, %55, %cst_25 [1] : vector<8x8xf32> to vector<8xf32>
    %57 = vector.shape_cast %56 : vector<8xf32> to vector<8x1xf32>
    %58 = vector.broadcast %57 : vector<8x1xf32> to vector<8x8xf32>
    %59 = arith.subf %55, %58 : vector<8x8xf32>
    %60 = math.exp %59 : vector<8x8xf32>
    %cst_26 = arith.constant dense<0.000000e+00> : vector<8xf32>
    %61 = vector.multi_reduction <add>, %60, %cst_26 [1] : vector<8x8xf32> to vector<8xf32>
    %62 = vector.shape_cast %61 : vector<8xf32> to vector<8x1xf32>
    %63 = arith.truncf %60 : vector<8x8xf32> to vector<8x8xbf16>
    %cst_27 = arith.constant dense<0.000000e+00> : vector<8x8xf32>
    %64 = tpu.matmul %63, %50, %cst_27 {dimension_numbers = #tpu.dot_dimension_numbers<[1], [0], [0], [1], [0, 0, 1, 1], [], []>} : vector<8x8xbf16>, vector<8x8xbf16>, vector<8x8xf32> -> vector<8x8xf32>
    %65 = tpu.reciprocal %62 {approx = true} : vector<8x1xf32> -> vector<8x1xf32>
    %66 = vector.broadcast %65 : vector<8x1xf32> to vector<8x8xf32>
    %67 = arith.mulf %64, %66 : vector<8x8xf32>
    %c0_28 = arith.constant 0 : index
    %c0_29 = arith.constant 0 : index
    %c0_30 = arith.constant 0 : index
    %68 = vector.load %arg20[%c0_28, %c0_29, %c0_30] : memref<2x8x32xf32, #tpu.memory_space<vmem>>, vector<1x8x8xf32>
    %69 = vector.shape_cast %68 : vector<1x8x8xf32> to vector<8x8xf32>
    %70 = vector.shape_cast %67 : vector<8x8xf32> to vector<1x8x8xf32>
    tpu.vector_store %arg20[%c0_28, %c0_29, %c0_30], %70 {strides = array<i32>} : memref<2x8x32xf32, #tpu.memory_space<vmem>>, vector<1x8x8xf32>,
    %71 = vector.extract_strided_slice %47 {offsets = [0, 8], sizes = [8, 8], strides = [1, 1]} : vector<8x96xbf16> to vector<8x8xbf16>
    %72 = vector.extract_strided_slice %47 {offsets = [0, 40], sizes = [8, 8], strides = [1, 1]} : vector<8x96xbf16> to vector<8x8xbf16>
    %73 = vector.extract_strided_slice %47 {offsets = [0, 72], sizes = [8, 8], strides = [1, 1]} : vector<8x96xbf16> to vector<8x8xbf16>
    %cst_31 = arith.constant dense<0.000000e+00> : vector<8x8xf32>
    %74 = tpu.matmul %71, %72, %cst_31 {dimension_numbers = #tpu.dot_dimension_numbers<[1], [1], [0], [0], [0, 0, 1, 0], [], []>} : vector<8x8xbf16>, vector<8x8xbf16>, vector<8x8xf32> -> vector<8x8xf32>
    %75 = vector.broadcast %45 : vector<1x8xf32> to vector<8x8xf32>
    %76 = arith.addf %74, %75 : vector<8x8xf32>
    %cst_32 = arith.constant -1.000000e+09 : f32
    %77 = vector.broadcast %cst_32 : f32 to vector<8x8xf32>
    %78 = arith.select %7, %77, %76 : vector<8x8xi1>, vector<8x8xf32>
    %cst_33 = arith.constant dense<0xFF800000> : vector<8xf32>
    %79 = vector.multi_reduction <maximumf>, %78, %cst_33 [1] : vector<8x8xf32> to vector<8xf32>
    %80 = vector.shape_cast %79 : vector<8xf32> to vector<8x1xf32>
    %81 = vector.broadcast %80 : vector<8x1xf32> to vector<8x8xf32>
    %82 = arith.subf %78, %81 : vector<8x8xf32>
    %83 = math.exp %82 : vector<8x8xf32>
    %cst_34 = arith.constant dense<0.000000e+00> : vector<8xf32>
    %84 = vector.multi_reduction <add>, %83, %cst_34 [1] : vector<8x8xf32> to vector<8xf32>
    %85 = vector.shape_cast %84 : vector<8xf32> to vector<8x1xf32>
    %86 = arith.truncf %83 : vector<8x8xf32> to vector<8x8xbf16>
    %cst_35 = arith.constant dense<0.000000e+00> : vector<8x8xf32>
    %87 = tpu.matmul %86, %73, %cst_35 {dimension_numbers = #tpu.dot_dimension_numbers<[1], [0], [0], [1], [0, 0, 1, 1], [], []>} : vector<8x8xbf16>, vector<8x8xbf16>, vector<8x8xf32> -> vector<8x8xf32>
    %88 = tpu.reciprocal %85 {approx = true} : vector<8x1xf32> -> vector<8x1xf32>
    %89 = vector.broadcast %88 : vector<8x1xf32> to vector<8x8xf32>
    %90 = arith.mulf %87, %89 : vector<8x8xf32>
    %c0_36 = arith.constant 0 : index
    %c0_37 = arith.constant 0 : index
    %c8 = arith.constant 8 : index
    %91 = vector.load %arg20[%c0_36, %c0_37, %c8] : memref<2x8x32xf32, #tpu.memory_space<vmem>>, vector<1x8x8xf32>
    %92 = vector.shape_cast %91 : vector<1x8x8xf32> to vector<8x8xf32>
    %93 = vector.shape_cast %90 : vector<8x8xf32> to vector<1x8x8xf32>
    tpu.vector_store %arg20[%c0_36, %c0_37, %c8], %93 {strides = array<i32>} : memref<2x8x32xf32, #tpu.memory_space<vmem>>, vector<1x8x8xf32>,
    %94 = vector.extract_strided_slice %47 {offsets = [0, 16], sizes = [8, 8], strides = [1, 1]} : vector<8x96xbf16> to vector<8x8xbf16>
    %95 = vector.extract_strided_slice %47 {offsets = [0, 48], sizes = [8, 8], strides = [1, 1]} : vector<8x96xbf16> to vector<8x8xbf16>
    %96 = vector.extract_strided_slice %47 {offsets = [0, 80], sizes = [8, 8], strides = [1, 1]} : vector<8x96xbf16> to vector<8x8xbf16>
    %cst_38 = arith.constant dense<0.000000e+00> : vector<8x8xf32>
    %97 = tpu.matmul %94, %95, %cst_38 {dimension_numbers = #tpu.dot_dimension_numbers<[1], [1], [0], [0], [0, 0, 1, 0], [], []>} : vector<8x8xbf16>, vector<8x8xbf16>, vector<8x8xf32> -> vector<8x8xf32>
    %98 = vector.broadcast %45 : vector<1x8xf32> to vector<8x8xf32>
    %99 = arith.addf %97, %98 : vector<8x8xf32>
    %cst_39 = arith.constant -1.000000e+09 : f32
    %100 = vector.broadcast %cst_39 : f32 to vector<8x8xf32>
    %101 = arith.select %7, %100, %99 : vector<8x8xi1>, vector<8x8xf32>
    %cst_40 = arith.constant dense<0xFF800000> : vector<8xf32>
    %102 = vector.multi_reduction <maximumf>, %101, %cst_40 [1] : vector<8x8xf32> to vector<8xf32>
    %103 = vector.shape_cast %102 : vector<8xf32> to vector<8x1xf32>
    %104 = vector.broadcast %103 : vector<8x1xf32> to vector<8x8xf32>
    %105 = arith.subf %101, %104 : vector<8x8xf32>
    %106 = math.exp %105 : vector<8x8xf32>
    %cst_41 = arith.constant dense<0.000000e+00> : vector<8xf32>
    %107 = vector.multi_reduction <add>, %106, %cst_41 [1] : vector<8x8xf32> to vector<8xf32>
    %108 = vector.shape_cast %107 : vector<8xf32> to vector<8x1xf32>
    %109 = arith.truncf %106 : vector<8x8xf32> to vector<8x8xbf16>
    %cst_42 = arith.constant dense<0.000000e+00> : vector<8x8xf32>
    %110 = tpu.matmul %109, %96, %cst_42 {dimension_numbers = #tpu.dot_dimension_numbers<[1], [0], [0], [1], [0, 0, 1, 1], [], []>} : vector<8x8xbf16>, vector<8x8xbf16>, vector<8x8xf32> -> vector<8x8xf32>
    %111 = tpu.reciprocal %108 {approx = true} : vector<8x1xf32> -> vector<8x1xf32>
    %112 = vector.broadcast %111 : vector<8x1xf32> to vector<8x8xf32>
    %113 = arith.mulf %110, %112 : vector<8x8xf32>
    %c0_43 = arith.constant 0 : index
    %c0_44 = arith.constant 0 : index
    %c16 = arith.constant 16 : index
    %114 = vector.load %arg20[%c0_43, %c0_44, %c16] : memref<2x8x32xf32, #tpu.memory_space<vmem>>, vector<1x8x8xf32>
    %115 = vector.shape_cast %114 : vector<1x8x8xf32> to vector<8x8xf32>
    %116 = vector.shape_cast %113 : vector<8x8xf32> to vector<1x8x8xf32>
    tpu.vector_store %arg20[%c0_43, %c0_44, %c16], %116 {strides = array<i32>} : memref<2x8x32xf32, #tpu.memory_space<vmem>>, vector<1x8x8xf32>,
    %117 = vector.extract_strided_slice %47 {offsets = [0, 24], sizes = [8, 8], strides = [1, 1]} : vector<8x96xbf16> to vector<8x8xbf16>
    %118 = vector.extract_strided_slice %47 {offsets = [0, 56], sizes = [8, 8], strides = [1, 1]} : vector<8x96xbf16> to vector<8x8xbf16>
    %119 = vector.extract_strided_slice %47 {offsets = [0, 88], sizes = [8, 8], strides = [1, 1]} : vector<8x96xbf16> to vector<8x8xbf16>
    %cst_45 = arith.constant dense<0.000000e+00> : vector<8x8xf32>
    %120 = tpu.matmul %117, %118, %cst_45 {dimension_numbers = #tpu.dot_dimension_numbers<[1], [1], [0], [0], [0, 0, 1, 0], [], []>} : vector<8x8xbf16>, vector<8x8xbf16>, vector<8x8xf32> -> vector<8x8xf32>
    %121 = vector.broadcast %45 : vector<1x8xf32> to vector<8x8xf32>
    %122 = arith.addf %120, %121 : vector<8x8xf32>
    %cst_46 = arith.constant -1.000000e+09 : f32
    %123 = vector.broadcast %cst_46 : f32 to vector<8x8xf32>
    %124 = arith.select %7, %123, %122 : vector<8x8xi1>, vector<8x8xf32>
    %cst_47 = arith.constant dense<0xFF800000> : vector<8xf32>
    %125 = vector.multi_reduction <maximumf>, %124, %cst_47 [1] : vector<8x8xf32> to vector<8xf32>
    %126 = vector.shape_cast %125 : vector<8xf32> to vector<8x1xf32>
    %127 = vector.broadcast %126 : vector<8x1xf32> to vector<8x8xf32>
    %128 = arith.subf %124, %127 : vector<8x8xf32>
    %129 = math.exp %128 : vector<8x8xf32>
    %cst_48 = arith.constant dense<0.000000e+00> : vector<8xf32>
    %130 = vector.multi_reduction <add>, %129, %cst_48 [1] : vector<8x8xf32> to vector<8xf32>
    %131 = vector.shape_cast %130 : vector<8xf32> to vector<8x1xf32>
    %132 = arith.truncf %129 : vector<8x8xf32> to vector<8x8xbf16>
    %cst_49 = arith.constant dense<0.000000e+00> : vector<8x8xf32>
    %133 = tpu.matmul %132, %119, %cst_49 {dimension_numbers = #tpu.dot_dimension_numbers<[1], [0], [0], [1], [0, 0, 1, 1], [], []>} : vector<8x8xbf16>, vector<8x8xbf16>, vector<8x8xf32> -> vector<8x8xf32>
    %134 = tpu.reciprocal %131 {approx = true} : vector<8x1xf32> -> vector<8x1xf32>
    %135 = vector.broadcast %134 : vector<8x1xf32> to vector<8x8xf32>
    %136 = arith.mulf %133, %135 : vector<8x8xf32>
    %c0_50 = arith.constant 0 : index
    %c0_51 = arith.constant 0 : index
    %c24 = arith.constant 24 : index
    %137 = vector.load %arg20[%c0_50, %c0_51, %c24] : memref<2x8x32xf32, #tpu.memory_space<vmem>>, vector<1x8x8xf32>
    %138 = vector.shape_cast %137 : vector<1x8x8xf32> to vector<8x8xf32>
    %139 = vector.shape_cast %136 : vector<8x8xf32> to vector<1x8x8xf32>
    tpu.vector_store %arg20[%c0_50, %c0_51, %c24], %139 {strides = array<i32>} : memref<2x8x32xf32, #tpu.memory_space<vmem>>, vector<1x8x8xf32>,
    %c1 = arith.constant 1 : index
    %c0_52 = arith.constant 0 : index
    %c0_53 = arith.constant 0 : index
    %140 = vector.load %arg3[%c1, %c0_52, %c0_53] : memref<2x1x8xf32, #tpu.memory_space<vmem>>, vector<1x1x8xf32>
    %141 = vector.shape_cast %140 : vector<1x1x8xf32> to vector<1x8xf32>
    %142 = vector.extract_strided_slice %43 {offsets = [1, 0, 0], sizes = [1, 8, 96], strides = [1, 1, 1]} : vector<2x8x96xbf16> to vector<1x8x96xbf16>
    %143 = vector.shape_cast %142 : vector<1x8x96xbf16> to vector<8x96xbf16>
    %144 = vector.extract_strided_slice %143 {offsets = [0, 0], sizes = [8, 8], strides = [1, 1]} : vector<8x96xbf16> to vector<8x8xbf16>
    %145 = vector.extract_strided_slice %143 {offsets = [0, 32], sizes = [8, 8], strides = [1, 1]} : vector<8x96xbf16> to vector<8x8xbf16>
    %146 = vector.extract_strided_slice %143 {offsets = [0, 64], sizes = [8, 8], strides = [1, 1]} : vector<8x96xbf16> to vector<8x8xbf16>
    %cst_54 = arith.constant dense<0.000000e+00> : vector<8x8xf32>
    %147 = tpu.matmul %144, %145, %cst_54 {dimension_numbers = #tpu.dot_dimension_numbers<[1], [1], [0], [0], [0, 0, 1, 0], [], []>} : vector<8x8xbf16>, vector<8x8xbf16>, vector<8x8xf32> -> vector<8x8xf32>
    %148 = vector.broadcast %141 : vector<1x8xf32> to vector<8x8xf32>
    %149 = arith.addf %147, %148 : vector<8x8xf32>
    %cst_55 = arith.constant -1.000000e+09 : f32
    %150 = vector.broadcast %cst_55 : f32 to vector<8x8xf32>
    %151 = arith.select %7, %150, %149 : vector<8x8xi1>, vector<8x8xf32>
    %cst_56 = arith.constant dense<0xFF800000> : vector<8xf32>
    %152 = vector.multi_reduction <maximumf>, %151, %cst_56 [1] : vector<8x8xf32> to vector<8xf32>
    %153 = vector.shape_cast %152 : vector<8xf32> to vector<8x1xf32>
    %154 = vector.broadcast %153 : vector<8x1xf32> to vector<8x8xf32>
    %155 = arith.subf %151, %154 : vector<8x8xf32>
    %156 = math.exp %155 : vector<8x8xf32>
    %cst_57 = arith.constant dense<0.000000e+00> : vector<8xf32>
    %157 = vector.multi_reduction <add>, %156, %cst_57 [1] : vector<8x8xf32> to vector<8xf32>
    %158 = vector.shape_cast %157 : vector<8xf32> to vector<8x1xf32>
    %159 = arith.truncf %156 : vector<8x8xf32> to vector<8x8xbf16>
    %cst_58 = arith.constant dense<0.000000e+00> : vector<8x8xf32>
    %160 = tpu.matmul %159, %146, %cst_58 {dimension_numbers = #tpu.dot_dimension_numbers<[1], [0], [0], [1], [0, 0, 1, 1], [], []>} : vector<8x8xbf16>, vector<8x8xbf16>, vector<8x8xf32> -> vector<8x8xf32>
    %161 = tpu.reciprocal %158 {approx = true} : vector<8x1xf32> -> vector<8x1xf32>
    %162 = vector.broadcast %161 : vector<8x1xf32> to vector<8x8xf32>
    %163 = arith.mulf %160, %162 : vector<8x8xf32>
    %c1_59 = arith.constant 1 : index
    %c0_60 = arith.constant 0 : index
    %c0_61 = arith.constant 0 : index
    %164 = vector.load %arg20[%c1_59, %c0_60, %c0_61] : memref<2x8x32xf32, #tpu.memory_space<vmem>>, vector<1x8x8xf32>
    %165 = vector.shape_cast %164 : vector<1x8x8xf32> to vector<8x8xf32>
    %166 = vector.shape_cast %163 : vector<8x8xf32> to vector<1x8x8xf32>
    tpu.vector_store %arg20[%c1_59, %c0_60, %c0_61], %166 {strides = array<i32>} : memref<2x8x32xf32, #tpu.memory_space<vmem>>, vector<1x8x8xf32>,
    %167 = vector.extract_strided_slice %143 {offsets = [0, 8], sizes = [8, 8], strides = [1, 1]} : vector<8x96xbf16> to vector<8x8xbf16>
    %168 = vector.extract_strided_slice %143 {offsets = [0, 40], sizes = [8, 8], strides = [1, 1]} : vector<8x96xbf16> to vector<8x8xbf16>
    %169 = vector.extract_strided_slice %143 {offsets = [0, 72], sizes = [8, 8], strides = [1, 1]} : vector<8x96xbf16> to vector<8x8xbf16>
    %cst_62 = arith.constant dense<0.000000e+00> : vector<8x8xf32>
    %170 = tpu.matmul %167, %168, %cst_62 {dimension_numbers = #tpu.dot_dimension_numbers<[1], [1], [0], [0], [0, 0, 1, 0], [], []>} : vector<8x8xbf16>, vector<8x8xbf16>, vector<8x8xf32> -> vector<8x8xf32>
    %171 = vector.broadcast %141 : vector<1x8xf32> to vector<8x8xf32>
    %172 = arith.addf %170, %171 : vector<8x8xf32>
    %cst_63 = arith.constant -1.000000e+09 : f32
    %173 = vector.broadcast %cst_63 : f32 to vector<8x8xf32>
    %174 = arith.select %7, %173, %172 : vector<8x8xi1>, vector<8x8xf32>
    %cst_64 = arith.constant dense<0xFF800000> : vector<8xf32>
    %175 = vector.multi_reduction <maximumf>, %174, %cst_64 [1] : vector<8x8xf32> to vector<8xf32>
    %176 = vector.shape_cast %175 : vector<8xf32> to vector<8x1xf32>
    %177 = vector.broadcast %176 : vector<8x1xf32> to vector<8x8xf32>
    %178 = arith.subf %174, %177 : vector<8x8xf32>
    %179 = math.exp %178 : vector<8x8xf32>
    %cst_65 = arith.constant dense<0.000000e+00> : vector<8xf32>
    %180 = vector.multi_reduction <add>, %179, %cst_65 [1] : vector<8x8xf32> to vector<8xf32>
    %181 = vector.shape_cast %180 : vector<8xf32> to vector<8x1xf32>
    %182 = arith.truncf %179 : vector<8x8xf32> to vector<8x8xbf16>
    %cst_66 = arith.constant dense<0.000000e+00> : vector<8x8xf32>
    %183 = tpu.matmul %182, %169, %cst_66 {dimension_numbers = #tpu.dot_dimension_numbers<[1], [0], [0], [1], [0, 0, 1, 1], [], []>} : vector<8x8xbf16>, vector<8x8xbf16>, vector<8x8xf32> -> vector<8x8xf32>
    %184 = tpu.reciprocal %181 {approx = true} : vector<8x1xf32> -> vector<8x1xf32>
    %185 = vector.broadcast %184 : vector<8x1xf32> to vector<8x8xf32>
    %186 = arith.mulf %183, %185 : vector<8x8xf32>
    %c1_67 = arith.constant 1 : index
    %c0_68 = arith.constant 0 : index
    %c8_69 = arith.constant 8 : index
    %187 = vector.load %arg20[%c1_67, %c0_68, %c8_69] : memref<2x8x32xf32, #tpu.memory_space<vmem>>, vector<1x8x8xf32>
    %188 = vector.shape_cast %187 : vector<1x8x8xf32> to vector<8x8xf32>
    %189 = vector.shape_cast %186 : vector<8x8xf32> to vector<1x8x8xf32>
    tpu.vector_store %arg20[%c1_67, %c0_68, %c8_69], %189 {strides = array<i32>} : memref<2x8x32xf32, #tpu.memory_space<vmem>>, vector<1x8x8xf32>,
    %190 = vector.extract_strided_slice %143 {offsets = [0, 16], sizes = [8, 8], strides = [1, 1]} : vector<8x96xbf16> to vector<8x8xbf16>
    %191 = vector.extract_strided_slice %143 {offsets = [0, 48], sizes = [8, 8], strides = [1, 1]} : vector<8x96xbf16> to vector<8x8xbf16>
    %192 = vector.extract_strided_slice %143 {offsets = [0, 80], sizes = [8, 8], strides = [1, 1]} : vector<8x96xbf16> to vector<8x8xbf16>
    %cst_70 = arith.constant dense<0.000000e+00> : vector<8x8xf32>
    %193 = tpu.matmul %190, %191, %cst_70 {dimension_numbers = #tpu.dot_dimension_numbers<[1], [1], [0], [0], [0, 0, 1, 0], [], []>} : vector<8x8xbf16>, vector<8x8xbf16>, vector<8x8xf32> -> vector<8x8xf32>
    %194 = vector.broadcast %141 : vector<1x8xf32> to vector<8x8xf32>
    %195 = arith.addf %193, %194 : vector<8x8xf32>
    %cst_71 = arith.constant -1.000000e+09 : f32
    %196 = vector.broadcast %cst_71 : f32 to vector<8x8xf32>
    %197 = arith.select %7, %196, %195 : vector<8x8xi1>, vector<8x8xf32>
    %cst_72 = arith.constant dense<0xFF800000> : vector<8xf32>
    %198 = vector.multi_reduction <maximumf>, %197, %cst_72 [1] : vector<8x8xf32> to vector<8xf32>
    %199 = vector.shape_cast %198 : vector<8xf32> to vector<8x1xf32>
    %200 = vector.broadcast %199 : vector<8x1xf32> to vector<8x8xf32>
    %201 = arith.subf %197, %200 : vector<8x8xf32>
    %202 = math.exp %201 : vector<8x8xf32>
    %cst_73 = arith.constant dense<0.000000e+00> : vector<8xf32>
    %203 = vector.multi_reduction <add>, %202, %cst_73 [1] : vector<8x8xf32> to vector<8xf32>
    %204 = vector.shape_cast %203 : vector<8xf32> to vector<8x1xf32>
    %205 = arith.truncf %202 : vector<8x8xf32> to vector<8x8xbf16>
    %cst_74 = arith.constant dense<0.000000e+00> : vector<8x8xf32>
    %206 = tpu.matmul %205, %192, %cst_74 {dimension_numbers = #tpu.dot_dimension_numbers<[1], [0], [0], [1], [0, 0, 1, 1], [], []>} : vector<8x8xbf16>, vector<8x8xbf16>, vector<8x8xf32> -> vector<8x8xf32>
    %207 = tpu.reciprocal %204 {approx = true} : vector<8x1xf32> -> vector<8x1xf32>
    %208 = vector.broadcast %207 : vector<8x1xf32> to vector<8x8xf32>
    %209 = arith.mulf %206, %208 : vector<8x8xf32>
    %c1_75 = arith.constant 1 : index
    %c0_76 = arith.constant 0 : index
    %c16_77 = arith.constant 16 : index
    %210 = vector.load %arg20[%c1_75, %c0_76, %c16_77] : memref<2x8x32xf32, #tpu.memory_space<vmem>>, vector<1x8x8xf32>
    %211 = vector.shape_cast %210 : vector<1x8x8xf32> to vector<8x8xf32>
    %212 = vector.shape_cast %209 : vector<8x8xf32> to vector<1x8x8xf32>
    tpu.vector_store %arg20[%c1_75, %c0_76, %c16_77], %212 {strides = array<i32>} : memref<2x8x32xf32, #tpu.memory_space<vmem>>, vector<1x8x8xf32>,
    %213 = vector.extract_strided_slice %143 {offsets = [0, 24], sizes = [8, 8], strides = [1, 1]} : vector<8x96xbf16> to vector<8x8xbf16>
    %214 = vector.extract_strided_slice %143 {offsets = [0, 56], sizes = [8, 8], strides = [1, 1]} : vector<8x96xbf16> to vector<8x8xbf16>
    %215 = vector.extract_strided_slice %143 {offsets = [0, 88], sizes = [8, 8], strides = [1, 1]} : vector<8x96xbf16> to vector<8x8xbf16>
    %cst_78 = arith.constant dense<0.000000e+00> : vector<8x8xf32>
    %216 = tpu.matmul %213, %214, %cst_78 {dimension_numbers = #tpu.dot_dimension_numbers<[1], [1], [0], [0], [0, 0, 1, 0], [], []>} : vector<8x8xbf16>, vector<8x8xbf16>, vector<8x8xf32> -> vector<8x8xf32>
    %217 = vector.broadcast %141 : vector<1x8xf32> to vector<8x8xf32>
    %218 = arith.addf %216, %217 : vector<8x8xf32>
    %cst_79 = arith.constant -1.000000e+09 : f32
    %219 = vector.broadcast %cst_79 : f32 to vector<8x8xf32>
    %220 = arith.select %7, %219, %218 : vector<8x8xi1>, vector<8x8xf32>
    %cst_80 = arith.constant dense<0xFF800000> : vector<8xf32>
    %221 = vector.multi_reduction <maximumf>, %220, %cst_80 [1] : vector<8x8xf32> to vector<8xf32>
    %222 = vector.shape_cast %221 : vector<8xf32> to vector<8x1xf32>
    %223 = vector.broadcast %222 : vector<8x1xf32> to vector<8x8xf32>
    %224 = arith.subf %220, %223 : vector<8x8xf32>
    %225 = math.exp %224 : vector<8x8xf32>
    %cst_81 = arith.constant dense<0.000000e+00> : vector<8xf32>
    %226 = vector.multi_reduction <add>, %225, %cst_81 [1] : vector<8x8xf32> to vector<8xf32>
    %227 = vector.shape_cast %226 : vector<8xf32> to vector<8x1xf32>
    %228 = arith.truncf %225 : vector<8x8xf32> to vector<8x8xbf16>
    %cst_82 = arith.constant dense<0.000000e+00> : vector<8x8xf32>
    %229 = tpu.matmul %228, %215, %cst_82 {dimension_numbers = #tpu.dot_dimension_numbers<[1], [0], [0], [1], [0, 0, 1, 1], [], []>} : vector<8x8xbf16>, vector<8x8xbf16>, vector<8x8xf32> -> vector<8x8xf32>
    %230 = tpu.reciprocal %227 {approx = true} : vector<8x1xf32> -> vector<8x1xf32>
    %231 = vector.broadcast %230 : vector<8x1xf32> to vector<8x8xf32>
    %232 = arith.mulf %229, %231 : vector<8x8xf32>
    %c1_83 = arith.constant 1 : index
    %c0_84 = arith.constant 0 : index
    %c24_85 = arith.constant 24 : index
    %233 = vector.load %arg20[%c1_83, %c0_84, %c24_85] : memref<2x8x32xf32, #tpu.memory_space<vmem>>, vector<1x8x8xf32>
    %234 = vector.shape_cast %233 : vector<1x8x8xf32> to vector<8x8xf32>
    %235 = vector.shape_cast %232 : vector<8x8xf32> to vector<1x8x8xf32>
    tpu.vector_store %arg20[%c1_83, %c0_84, %c24_85], %235 {strides = array<i32>} : memref<2x8x32xf32, #tpu.memory_space<vmem>>, vector<1x8x8xf32>,
    %c0_86 = arith.constant 0 : index
    %c0_87 = arith.constant 0 : index
    %c0_88 = arith.constant 0 : index
    %236 = vector.load %arg20[%c0_86, %c0_87, %c0_88] : memref<2x8x32xf32, #tpu.memory_space<vmem>>, vector<2x8x32xf32>
    %237 = vector.shape_cast %236 : vector<2x8x32xf32> to vector<16x32xf32>
    %238 = arith.truncf %237 : vector<16x32xf32> to vector<16x32xbf16>
    %c0_89 = arith.constant 0 : index
    %c0_90 = arith.constant 0 : index
    %c0_91 = arith.constant 0 : index
    %239 = vector.load %arg8[%c0_89, %c0_90, %c0_91] : memref<1x32x32xbf16, #tpu.memory_space<vmem>>, vector<1x32x32xbf16>
    %240 = vector.shape_cast %239 : vector<1x32x32xbf16> to vector<32x32xbf16>
    %cst_92 = arith.constant dense<0.000000e+00> : vector<16x32xf32>
    %241 = tpu.matmul %238, %240, %cst_92 {dimension_numbers = #tpu.dot_dimension_numbers<[1], [0], [0], [1], [0, 0, 1, 1], [], []>} : vector<16x32xbf16>, vector<32x32xbf16>, vector<16x32xf32> -> vector<16x32xf32>
    %c0_93 = arith.constant 0 : index
    %c0_94 = arith.constant 0 : index
    %c0_95 = arith.constant 0 : index
    %242 = vector.load %arg9[%c0_93, %c0_94, %c0_95] : memref<1x1x32xf32, #tpu.memory_space<vmem>>, vector<1x1x32xf32>
    %243 = vector.shape_cast %242 : vector<1x1x32xf32> to vector<1x32xf32>
    %244 = vector.broadcast %243 : vector<1x32xf32> to vector<16x32xf32>
    %245 = arith.addf %241, %244 : vector<16x32xf32>
    %246 = arith.addf %4, %245 : vector<16x32xf32>
    %c0_96 = arith.constant 0 : index
    %c0_97 = arith.constant 0 : index
    %c0_98 = arith.constant 0 : index
    %247 = vector.load %arg10[%c0_96, %c0_97, %c0_98] : memref<1x1x32xf32, #tpu.memory_space<vmem>>, vector<1x1x32xf32>
    %248 = vector.shape_cast %247 : vector<1x1x32xf32> to vector<1x32xf32>
    %c0_99 = arith.constant 0 : index
    %c0_100 = arith.constant 0 : index
    %c0_101 = arith.constant 0 : index
    %249 = vector.load %arg11[%c0_99, %c0_100, %c0_101] : memref<1x1x32xf32, #tpu.memory_space<vmem>>, vector<1x1x32xf32>
    %250 = vector.shape_cast %249 : vector<1x1x32xf32> to vector<1x32xf32>
    %cst_102 = arith.constant dense<0.000000e+00> : vector<16xf32>
    %251 = vector.multi_reduction <add>, %246, %cst_102 [1] : vector<16x32xf32> to vector<16xf32>
    %252 = vector.shape_cast %251 : vector<16xf32> to vector<16x1xf32>
    %cst_103 = arith.constant 3.200000e+01 : f32
    %253 = vector.broadcast %cst_103 : f32 to vector<16x1xf32>
    %254 = arith.divf %252, %253 : vector<16x1xf32>
    %255 = vector.broadcast %254 : vector<16x1xf32> to vector<16x32xf32>
    %256 = arith.subf %246, %255 : vector<16x32xf32>
    %257 = arith.mulf %256, %256 : vector<16x32xf32>
    %cst_104 = arith.constant dense<0.000000e+00> : vector<16xf32>
    %258 = vector.multi_reduction <add>, %257, %cst_104 [1] : vector<16x32xf32> to vector<16xf32>
    %259 = vector.shape_cast %258 : vector<16xf32> to vector<16x1xf32>
    %cst_105 = arith.constant 3.200000e+01 : f32
    %260 = vector.broadcast %cst_105 : f32 to vector<16x1xf32>
    %261 = arith.divf %259, %260 : vector<16x1xf32>
    %262 = vector.broadcast %254 : vector<16x1xf32> to vector<16x32xf32>
    %263 = arith.subf %246, %262 : vector<16x32xf32>
    %cst_106 = arith.constant 9.99999974E-6 : f32
    %264 = vector.broadcast %cst_106 : f32 to vector<16x1xf32>
    %265 = arith.addf %261, %264 : vector<16x1xf32>
    %266 = math.rsqrt %265 : vector<16x1xf32>
    %267 = vector.broadcast %266 : vector<16x1xf32> to vector<16x32xf32>
    %268 = arith.mulf %263, %267 : vector<16x32xf32>
    %269 = vector.broadcast %248 : vector<1x32xf32> to vector<16x32xf32>
    %270 = arith.mulf %268, %269 : vector<16x32xf32>
    %271 = vector.broadcast %250 : vector<1x32xf32> to vector<16x32xf32>
    %272 = arith.addf %270, %271 : vector<16x32xf32>
    %273 = arith.truncf %272 : vector<16x32xf32> to vector<16x32xbf16>
    %cst_107 = arith.constant 0.000000e+00 : f32
    %274 = vector.broadcast %cst_107 : f32 to vector<16x32xf32>
    %c0_108 = arith.constant 0 : index
    %c0_109 = arith.constant 0 : index
    %c0_110 = arith.constant 0 : index
    %275 = vector.load %arg12[%c0_108, %c0_109, %c0_110] : memref<1x32x128xbf16, #tpu.memory_space<vmem>>, vector<1x32x128xbf16>
    %276 = vector.shape_cast %275 : vector<1x32x128xbf16> to vector<32x128xbf16>
    %cst_111 = arith.constant dense<0.000000e+00> : vector<16x128xf32>
    %277 = tpu.matmul %273, %276, %cst_111 {dimension_numbers = #tpu.dot_dimension_numbers<[1], [0], [0], [1], [0, 0, 1, 1], [], []>} : vector<16x32xbf16>, vector<32x128xbf16>, vector<16x128xf32> -> vector<16x128xf32>
    %c0_112 = arith.constant 0 : index
    %c0_113 = arith.constant 0 : index
    %c0_114 = arith.constant 0 : index
    %278 = vector.load %arg13[%c0_112, %c0_113, %c0_114] : memref<1x1x128xf32, #tpu.memory_space<vmem>>, vector<1x1x128xf32>
    %279 = vector.shape_cast %278 : vector<1x1x128xf32> to vector<1x128xf32>
    %280 = vector.broadcast %279 : vector<1x128xf32> to vector<16x128xf32>
    %281 = arith.addf %277, %280 : vector<16x128xf32>
    %cst_115 = arith.constant 5.000000e-01 : f32
    %282 = vector.broadcast %cst_115 : f32 to vector<16x128xf32>
    %283 = arith.mulf %282, %281 : vector<16x128xf32>
    %cst_116 = arith.constant 4.471500e-02 : f32
    %284 = vector.broadcast %cst_116 : f32 to vector<16x128xf32>
    %285 = arith.mulf %284, %281 : vector<16x128xf32>
    %286 = arith.mulf %285, %281 : vector<16x128xf32>
    %287 = arith.mulf %286, %281 : vector<16x128xf32>
    %288 = arith.addf %281, %287 : vector<16x128xf32>
    %cst_117 = arith.constant 0.797884583 : f32
    %289 = vector.broadcast %cst_117 : f32 to vector<16x128xf32>
    %290 = arith.mulf %289, %288 : vector<16x128xf32>
    %291 = math.tanh %290 : vector<16x128xf32>
    %cst_118 = arith.constant 1.000000e+00 : f32
    %292 = vector.broadcast %cst_118 : f32 to vector<16x128xf32>
    %293 = arith.addf %292, %291 : vector<16x128xf32>
    %294 = arith.mulf %283, %293 : vector<16x128xf32>
    %295 = arith.truncf %294 : vector<16x128xf32> to vector<16x128xbf16>
    %c0_119 = arith.constant 0 : index
    %c0_120 = arith.constant 0 : index
    %c0_121 = arith.constant 0 : index
    %296 = vector.load %arg14[%c0_119, %c0_120, %c0_121] : memref<1x128x32xbf16, #tpu.memory_space<vmem>>, vector<1x128x32xbf16>
    %297 = vector.shape_cast %296 : vector<1x128x32xbf16> to vector<128x32xbf16>
    %cst_122 = arith.constant dense<0.000000e+00> : vector<16x32xf32>
    %298 = tpu.matmul %295, %297, %cst_122 {dimension_numbers = #tpu.dot_dimension_numbers<[1], [0], [0], [1], [0, 0, 1, 1], [], []>} : vector<16x128xbf16>, vector<128x32xbf16>, vector<16x32xf32> -> vector<16x32xf32>
    %299 = arith.addf %274, %298 : vector<16x32xf32>
    %300 = arith.addf %246, %299 : vector<16x32xf32>
    %c0_123 = arith.constant 0 : index
    %c0_124 = arith.constant 0 : index
    %c0_125 = arith.constant 0 : index
    %301 = vector.load %arg15[%c0_123, %c0_124, %c0_125] : memref<1x1x32xf32, #tpu.memory_space<vmem>>, vector<1x1x32xf32>
    %302 = vector.shape_cast %301 : vector<1x1x32xf32> to vector<1x32xf32>
    %303 = vector.broadcast %302 : vector<1x32xf32> to vector<16x32xf32>
    %304 = arith.addf %300, %303 : vector<16x32xf32>
    %305 = vector.shape_cast %304 : vector<16x32xf32> to vector<2x8x32xf32>
    %c0_126 = arith.constant 0 : index
    %c0_127 = arith.constant 0 : index
    %c0_128 = arith.constant 0 : index
    %306 = vector.load %arg19[%c0_126, %c0_127, %c0_128] : memref<2x8x32xf32, #tpu.memory_space<vmem>>, vector<2x8x32xf32>
    tpu.vector_store %arg19[%c0_126, %c0_127, %c0_128], %305 {strides = array<i32>} : memref<2x8x32xf32, #tpu.memory_space<vmem>>, vector<2x8x32xf32>,
    %c1_i32 = arith.constant 1 : i32
    %307 = arith.cmpi eq, %arg1, %c1_i32 : i32
    %308 = arith.extui %307 : i1 to i32
    %c0_i32_129 = arith.constant 0 : i32
    %309 = arith.cmpi ne, %308, %c0_i32_129 : i32
    scf.if %309 {
      %c0_130 = arith.constant 0 : index
      %c0_131 = arith.constant 0 : index
      %310 = vector.load %arg16[%c0_130, %c0_131] : memref<1x32xf32, #tpu.memory_space<vmem>>, vector<1x32xf32>
      %c0_132 = arith.constant 0 : index
      %c0_133 = arith.constant 0 : index
      %311 = vector.load %arg17[%c0_132, %c0_133] : memref<1x32xf32, #tpu.memory_space<vmem>>, vector<1x32xf32>
      %cst_134 = arith.constant dense<0.000000e+00> : vector<16xf32>
      %312 = vector.multi_reduction <add>, %304, %cst_134 [1] : vector<16x32xf32> to vector<16xf32>
      %313 = vector.shape_cast %312 : vector<16xf32> to vector<16x1xf32>
      %cst_135 = arith.constant 3.200000e+01 : f32
      %314 = vector.broadcast %cst_135 : f32 to vector<16x1xf32>
      %315 = arith.divf %313, %314 : vector<16x1xf32>
      %316 = vector.broadcast %315 : vector<16x1xf32> to vector<16x32xf32>
      %317 = arith.subf %304, %316 : vector<16x32xf32>
      %318 = arith.mulf %317, %317 : vector<16x32xf32>
      %cst_136 = arith.constant dense<0.000000e+00> : vector<16xf32>
      %319 = vector.multi_reduction <add>, %318, %cst_136 [1] : vector<16x32xf32> to vector<16xf32>
      %320 = vector.shape_cast %319 : vector<16xf32> to vector<16x1xf32>
      %cst_137 = arith.constant 3.200000e+01 : f32
      %321 = vector.broadcast %cst_137 : f32 to vector<16x1xf32>
      %322 = arith.divf %320, %321 : vector<16x1xf32>
      %323 = vector.broadcast %315 : vector<16x1xf32> to vector<16x32xf32>
      %324 = arith.subf %304, %323 : vector<16x32xf32>
      %cst_138 = arith.constant 9.99999974E-6 : f32
      %325 = vector.broadcast %cst_138 : f32 to vector<16x1xf32>
      %326 = arith.addf %322, %325 : vector<16x1xf32>
      %327 = math.rsqrt %326 : vector<16x1xf32>
      %328 = vector.broadcast %327 : vector<16x1xf32> to vector<16x32xf32>
      %329 = arith.mulf %324, %328 : vector<16x32xf32>
      %330 = vector.broadcast %310 : vector<1x32xf32> to vector<16x32xf32>
      %331 = arith.mulf %329, %330 : vector<16x32xf32>
      %332 = vector.broadcast %311 : vector<1x32xf32> to vector<16x32xf32>
      %333 = arith.addf %331, %332 : vector<16x32xf32>
      %334 = arith.truncf %333 : vector<16x32xf32> to vector<16x32xbf16>
      %335 = vector.shape_cast %334 : vector<16x32xbf16> to vector<2x8x32xbf16>
      %c0_139 = arith.constant 0 : index
      %c0_140 = arith.constant 0 : index
      %c0_141 = arith.constant 0 : index
      %336 = vector.load %arg18[%c0_139, %c0_140, %c0_141] : memref<2x8x32xbf16, #tpu.memory_space<vmem>>, vector<2x8x32xbf16>
      tpu.vector_store %arg18[%c0_139, %c0_140, %c0_141], %335 {strides = array<i32>} : memref<2x8x32xbf16, #tpu.memory_space<vmem>>, vector<2x8x32xbf16>,
    } else {
    }
    return
  }
  func.func @transform_0(%arg0: i32, %arg1: i32) -> (i32, i32, i32) {
    %c0_i32 = arith.constant 0 : i32
    %c0_i32_0 = arith.constant 0 : i32
    %c0_i32_1 = arith.constant 0 : i32
    return %arg0, %c0_i32, %c0_i32_0 : i32, i32, i32
  }
  func.func @transform_1(%arg0: i32, %arg1: i32) -> (i32, i32, i32) {
    %c0_i32 = arith.constant 0 : i32
    %c0_i32_0 = arith.constant 0 : i32
    %c0_i32_1 = arith.constant 0 : i32
    return %arg0, %c0_i32, %c0_i32_0 : i32, i32, i32
  }
  func.func @transform_2(%arg0: i32, %arg1: i32) -> (i32, i32, i32) {
    %c0_i32 = arith.constant 0 : i32
    %c0_i32_0 = arith.constant 0 : i32
    %c0_i32_1 = arith.constant 0 : i32
    return %arg1, %c0_i32, %c0_i32_0 : i32, i32, i32
  }
  func.func @transform_3(%arg0: i32, %arg1: i32) -> (i32, i32, i32) {
    %c0_i32 = arith.constant 0 : i32
    %c0_i32_0 = arith.constant 0 : i32
    %c0_i32_1 = arith.constant 0 : i32
    return %arg1, %c0_i32, %c0_i32_0 : i32, i32, i32
  }
  func.func @transform_4(%arg0: i32, %arg1: i32) -> (i32, i32, i32) {
    %c0_i32 = arith.constant 0 : i32
    %c0_i32_0 = arith.constant 0 : i32
    %c0_i32_1 = arith.constant 0 : i32
    return %arg1, %c0_i32, %c0_i32_0 : i32, i32, i32
  }
  func.func @transform_5(%arg0: i32, %arg1: i32) -> (i32, i32, i32) {
    %c0_i32 = arith.constant 0 : i32
    %c0_i32_0 = arith.constant 0 : i32
    %c0_i32_1 = arith.constant 0 : i32
    return %arg1, %c0_i32, %c0_i32_0 : i32, i32, i32
  }
  func.func @transform_6(%arg0: i32, %arg1: i32) -> (i32, i32, i32) {
    %c0_i32 = arith.constant 0 : i32
    %c0_i32_0 = arith.constant 0 : i32
    %c0_i32_1 = arith.constant 0 : i32
    return %arg1, %c0_i32, %c0_i32_0 : i32, i32, i32
  }
  func.func @transform_7(%arg0: i32, %arg1: i32) -> (i32, i32, i32) {
    %c0_i32 = arith.constant 0 : i32
    %c0_i32_0 = arith.constant 0 : i32
    %c0_i32_1 = arith.constant 0 : i32
    return %arg1, %c0_i32, %c0_i32_0 : i32, i32, i32
  }
  func.func @transform_8(%arg0: i32, %arg1: i32) -> (i32, i32, i32) {
    %c0_i32 = arith.constant 0 : i32
    %c0_i32_0 = arith.constant 0 : i32
    %c0_i32_1 = arith.constant 0 : i32
    return %arg1, %c0_i32, %c0_i32_0 : i32, i32, i32
  }
  func.func @transform_9(%arg0: i32, %arg1: i32) -> (i32, i32, i32) {
    %c0_i32 = arith.constant 0 : i32
    %c0_i32_0 = arith.constant 0 : i32
    %c0_i32_1 = arith.constant 0 : i32
    return %arg1, %c0_i32, %c0_i32_0 : i32, i32, i32
  }
  func.func @transform_10(%arg0: i32, %arg1: i32) -> (i32, i32, i32) {
    %c0_i32 = arith.constant 0 : i32
    %c0_i32_0 = arith.constant 0 : i32
    %c0_i32_1 = arith.constant 0 : i32
    return %arg1, %c0_i32, %c0_i32_0 : i32, i32, i32
  }
  func.func @transform_11(%arg0: i32, %arg1: i32) -> (i32, i32, i32) {
    %c0_i32 = arith.constant 0 : i32
    %c0_i32_0 = arith.constant 0 : i32
    %c0_i32_1 = arith.constant 0 : i32
    return %arg1, %c0_i32, %c0_i32_0 : i32, i32, i32
  }
  func.func @transform_12(%arg0: i32, %arg1: i32) -> (i32, i32, i32) {
    %c0_i32 = arith.constant 0 : i32
    %c0_i32_0 = arith.constant 0 : i32
    %c0_i32_1 = arith.constant 0 : i32
    return %arg1, %c0_i32, %c0_i32_0 : i32, i32, i32
  }
  func.func @transform_13(%arg0: i32, %arg1: i32) -> (i32, i32, i32) {
    %c0_i32 = arith.constant 0 : i32
    %c0_i32_0 = arith.constant 0 : i32
    %c0_i32_1 = arith.constant 0 : i32
    return %arg1, %c0_i32, %c0_i32_0 : i32, i32, i32
  }
  func.func @transform_14(%arg0: i32, %arg1: i32) -> (i32, i32) {
    %c0_i32 = arith.constant 0 : i32
    %c0_i32_0 = arith.constant 0 : i32
    %c0_i32_1 = arith.constant 0 : i32
    return %c0_i32, %c0_i32_0 : i32, i32
  }
  func.func @transform_15(%arg0: i32, %arg1: i32) -> (i32, i32) {
    %c0_i32 = arith.constant 0 : i32
    %c0_i32_0 = arith.constant 0 : i32
    %c0_i32_1 = arith.constant 0 : i32
    return %c0_i32, %c0_i32_0 : i32, i32
  }
  func.func @transform_16(%arg0: i32, %arg1: i32) -> (i32, i32, i32) {
    %c0_i32 = arith.constant 0 : i32
    %c0_i32_0 = arith.constant 0 : i32
    %c0_i32_1 = arith.constant 0 : i32
    return %arg0, %c0_i32, %c0_i32_0 : i32, i32, i32
  }
}

</mosaic_0001>

<bundles_post_ra>
// kernel: tpu_custom_call.1
= control target key start
LH: loop header
LB: loop body
LE: loop exit
PB: predicated region body
PF: predicated region fallthrough
CT: control target
= control target key end

     0   :  { %s3560_s0 = inlined_call_operand.vmem [shape: f32[4,8,32], index: 0, kind: input, shape index: {}]   ;;  %s3561_s1 = inlined_call_operand.vmem [shape: f32[4,1,8], index: 1, kind: input, shape index: {}]   ;;  %s3562_s2 = inlined_call_operand.vmem [shape: f32[2,1,32], index: 2, kind: input, shape index: {}]   ;;  %s3563_s3 = inlined_call_operand.vmem [shape: f32[2,1,32], index: 3, kind: input, shape index: {}]   ;;  %s3564_s4 = inlined_call_operand.vmem [shape: bf16[2,32,96], index: 4, kind: input, shape index: {}]   ;;  %s3565_s5 = inlined_call_operand.vmem [shape: f32[2,1,96], index: 5, kind: input, shape index: {}]   ;;  %s3566_s6 = inlined_call_operand.vmem [shape: bf16[2,32,32], index: 6, kind: input, shape index: {}]   ;;  %s3567_s7 = inlined_call_operand.vmem [shape: f32[2,1,32], index: 7, kind: input, shape index: {}]   ;;  %s3568_s8 = inlined_call_operand.vmem [shape: f32[2,1,32], index: 8, kind: input, shape index: {}]   ;;  %s3569_s9 = inlined_call_operand.vmem [shape: f32[2,1,32], index: 9, kind: input, shape index: {}]   ;;  %s3570_s10 = inlined_call_operand.vmem [shape: bf16[2,32,128], index: 10, kind: input, shape index: {}]   ;;  %s3571_s11 = inlined_call_operand.vmem [shape: f32[2,1,128], index: 11, kind: input, shape index: {}]   ;;  %s3572_s12 = inlined_call_operand.vmem [shape: bf16[2,128,32], index: 12, kind: input, shape index: {}]   ;;  %s3573_s13 = inlined_call_operand.vmem [shape: f32[2,1,32], index: 13, kind: input, shape index: {}]   ;;  %s3574_s14 = inlined_call_operand.vmem [shape: f32[1,32], index: 14, kind: input, shape index: {}]   ;;  %s3575_s15 = inlined_call_operand.vmem [shape: f32[1,32], index: 15, kind: input, shape index: {}]   ;;  %s3576_s16 = inlined_call_operand.hbm [shape: bf16[4,8,32], index: 16, kind: output, shape index: {}]  }
   0x1   :  { %3592 = sst [smem:[#allocation20_spill]] %s3560_s0 }
   0x2   :  { %3593 = sst [smem:[#allocation21_spill]] %s3561_s1 }
   0x3   :  { %3594 = sst [smem:[#allocation22_spill]] %s3564_s4 }
   0x4   :  { %3595 = sst [smem:[#allocation23_spill]] %s3566_s6 }
   0x5   :  { %3596 = sst [smem:[#allocation24_spill]] %s3567_s7 }
   0x6   :  { %3597 = sst [smem:[#allocation25_spill]] %s3568_s8 }
   0x7   :  { %3598 = sst [smem:[#allocation26_spill]] %s3571_s11 }
   0x8   :  { %3599 = sst [smem:[#allocation27_spill]] %s3572_s12 }
   0x9   :  { %3600 = sst [smem:[#allocation28_spill]] %s3573_s13 }
   0xa   :  { %3601 = sst [smem:[#allocation29_spill]] %s3574_s14 }
   0xb   :  { %3602 = sst [smem:[#allocation30_spill]] %s3575_s15 }
   0xc   :  { %3603 = sst [smem:[#allocation31_spill]] %s3576_s16 }
   0xd   :  { %21 = vsyncpa [#allocation5], 0 }
   0xe   :  { %23 = vsyncpa [#allocation5 + $0x1], 0  ;;  %s3038_s21 = smov 0   ;;  %s3040_s22 = smov 0  }
   0xf   :  { %s3042_s23 = smov 0   ;;  %s3044_s24 = smov 0  }
  0x10   :  { %s3046_s25 = smov 0   ;;  %s3048_s26 = smov 0  }
  0x11   :  { %s3050_s27 = smov 0   ;;  %s3052_s28 = smov 0  }
  0x12 LB: > { %3604 = sst [smem:[#allocation7_spill]] %s2905_s21  ;;  %s2416_s29 = sadd.s32 4294967295, %s2933_s28   ;;  %s2933_s28 = sphi %s3052_s28, %s29_s28   ;;  %s2929_s27 = sphi %s3050_s27, %s3658_s27   ;;  %s2925_s26 = sphi %s3048_s26, %s3657_s26   ;;  %s2921_s25 = sphi %s3046_s25, %s3656_s25   ;;  %s2917_s24 = sphi %s3044_s24, %s3655_s24   ;;  %s2913_s23 = sphi %s3042_s23, %s3654_s23   ;;  %s2909_s22 = sphi %s3040_s22, %s3653_s22   ;;  %s2905_s21 = sphi %s3038_s21, %s3652_s21  }
  0x13   : > { %3605 = sst [smem:[#allocation8_spill]] %s2909_s22  ;;  %s2417_s30 = sadd.s32 4294967294, %s2933_s28  }
  0x14   : > { %3606 = sst [smem:[#allocation9_spill]] %s2913_s23  ;;  %s38_s0 = sadd.s32 1, %s2925_s26 }
  0x15   : > { %3607 = sst [smem:[#allocation10_spill]] %s2917_s24  ;;  %p39_p0 = scmp.ge.s32.totalorder %s38_s0, 2 }
  0x16   : > { %3608 = sst [smem:[#allocation11_spill]] %s2921_s25  ;;  %s41_s17 = sadd.s32 1, %s2929_s27 }
  0x17   : > { %3609 = sst [smem:[#allocation12_spill]] %s2925_s26  ;;  %p464_p1 = scmp.ne.s32.totalorder %s2913_s23, %s2909_s22 }
  0x18   : > { %3610 = sst [smem:[#allocation13_spill]] %s2929_s27  ;;  %p465_p2 = scmp.eq.s32.totalorder %s2416_s29, 3 }
  0x19   : > { %3611 = sst [smem:[#allocation14_spill]] %s2933_s28  ;;  %s3660_s0 = smov (%p39_p0, %s38_s0), 0 }
  0x1a   : > { %3612 = sst [smem:[#allocation15_spill]] %s3660_s0  ;;  %s3662_s17 = smov (!%p39_p0, %s41_s17), %s2929_s27 }
  0x1b   : > { %p3087_p3 = por %p465_p2, %p464_p1  ;;  %p470_p4 = scmp.ne.s32.totalorder %s2909_s22, %s2905_s21 }
  0x1c   : > { %p43_p5 = scmp.ge.s32.totalorder %s3662_s17, 2  ;;  %p471_p6 = scmp.eq.s32.totalorder %s2417_s30, 3 }
  0x1d   : > { %s3613_s18 = scalar_select %p3087_p3, 1, 0 }
  0x1e   : > { %p2420_p7 = scmp.ge.s32.totalorder %s2933_s28, 1  ;;  %p592_p8 = scmp.lt.s32.totalorder %s2933_s28, 5 }
  0x1f   : > { %3614 = sst [smem:[#allocation16_spill]] %s3613_s18  ;;  %s3664_s17 = smov (%p43_p5, %s3662_s17), 0 }
  0x20   : > { %3615 = sst [smem:[#allocation17_spill]] %s3664_s17  ;;  %p3097_p9 = por %p471_p6, %p470_p4 }
  0x21   : > { %p593_p10 = pnand %p2420_p7, %p592_p8  ;;  %s451_s20 = ssub.s32 %s2929_s27, %s3664_s17 }
  0x22   : > { %s3616_s19 = scalar_select %p3097_p9, 1, 0 }
  0x23   : > { %s454_s29 = sadd.s32 1, %s2913_s23  ;;  %p452_p11 = scmp.eq.s32.totalorder %s451_s20, 0 }
  0x24   : > { %3617 = sst [smem:[#allocation18_spill]] %s3616_s19  ;;  %596 = sbr.rel (%p593_p10) target bundleno = 2891 (0xb4b), region = 84 }
  0x25   : > { %s3105_s0 = scalar_select %p452_p11, %s2913_s23, %s454_s29  }
  0x26   : > { %s3581_s30 = sand.u32 (!%p593_p10), 1, %s2909_s22   ;;  %s2422_s26 = sshll.u32 (!%p593_p10), %s2921_s25, 1 }
  0x27   : > { %3618 = sst [smem:[#allocation19_spill]] %s3105_s0  ;;  %s2421_s21 = sshll.u32 (!%p593_p10), %s3581_s30, 3 }
  0x28   : > { %p691_p12 = scmp.lt.s32.totalorder (!%p593_p10), %s2422_s26, 3  ;;  %p701_p13 = scmp.lt.s32.totalorder (!%p593_p10), %s2917_s24, 1 }
  0x29   : > { %s3619_s1 = sld [smem:[#allocation21_spill]] (!%p593_p10)  ;;  %s3620_s23 = sld [smem:[#allocation20_spill]] (!%p593_p10) }
  0x2a   : > { %s3621_s4 = sld [smem:[#allocation22_spill]] (!%p593_p10)  ;;  %s3622_s6 = sld [smem:[#allocation23_spill]] (!%p593_p10) }
  0x2b   : > { %s3666_s26 = smov (!%p691_p12, %s2422_s26), 3  ;;  %s3625_s29 = sld [smem:[#allocation26_spill]] }
  0x2c   : > { %s3113_s19 = scalar_select %p701_p13, %s2917_s24, 1 }
  0x2d   : > { %s2423_s20 = sshll.u32 %s3666_s26, 3  ;;  %s3626_s15 = sld [smem:[#allocation28_spill]] }
  0x2e   : > { %s2490_s24 = sshll.u32 %s3113_s19, 4  ;;  %s728_s22 = scalar_lea.vmem %s3569_s9, %s3113_s19 }
  0x2f   : > { %s3118_s30 = scalar_lea.vmem %s3619_s1, %s3666_s26  ;;  %s694_s28 = scalar_lea.vmem %s3620_s23, %s2423_s20 }
  0x30   : > { %s3135_s11 = scalar_lea.vmem %s3621_s4, %s2490_s24  ;;  %s3144_s0 = scalar_lea.vmem %s3622_s6, %s2490_s24 }
  0x31   : > { %s3161_s17 = scalar_lea.vmem %s3570_s10, %s2490_s24  ;;  %s736_s4 = scalar_lea.vmem %s3625_s29, %s3113_s19 }
  0x32   : > { %s2493_s6 = sshll.u32 %s3113_s19, 6  ;;  %s3627_s14 = sld [smem:[#allocation27_spill]] }
  0x33   : > { %s744_s7 = scalar_lea.vmem %s3626_s15, %s3113_s19  ;;  %s3177_s12 = scalar_lea.vmem [#allocation4], %s2421_s21 }
  0x34   : > { %s3628_s13 = sld [smem:[#allocation10_spill]] }
  0x38   : > { %s3175_s8 = scalar_lea.vmem %s3627_s14, %s2493_s6 }
  0x3a   : > { %p2433_p0 = scmp.ne.s32.totalorder %s3628_s13, 0 }
  0x3b   : > { %v751_v0 = vld [vmem:[%s694_s28] sm:$0xff] (!%p2433_p0)  ;;  %vm753_vm0 = vcmask (!%p2433_p0), 261120   ;;  %v752_v1 = vld [vmem:[%s694_s28 + $0x8] sm:$0xff] (!%p2433_p0) }
  0x3c   : > { %750 = sbr.rel (%p2433_p0) target bundleno = 67 (0x43), region = 88  ;;  %754 = vst.msk [vmem:[#allocation2] sm:$0xff] (!%p2433_p0), %vm753_vm0, %v751_v0  ;;  %755 = vst.msk [vmem:[#allocation2 + $0x8] sm:$0xff] (!%p2433_p0), %vm753_vm0, %v752_v1 }
  0x43 PF: > { %v3180_v2 = vld [vmem:[#allocation2] sm:$0xff]  ;;  %vm765_vm1 = vcmask 261120   ;;  %v3182_v3 = vld [vmem:[#allocation2 + $0x8] sm:$0xff]  ;;  %v2935_v17 = vmov 0.0   ;;  %vm2936_vm2 = vmmov 0   ;;  %s3630_s24 = scalar_lea.vmem %s3563_s3, %s3113_s19  ;;  %s3631_s15 = scalar_lea.vmem %s3565_s5, %s3113_s19  ;;  %vm892_vm3 = vcmask 64512  }
  0x44   : > { %v766_v4 = vsel %vm765_vm1, %v3180_v2, 0.0  ;;  %v769_v5 = vsel %vm765_vm1, %v3182_v3, 0.0  ;;  %v2777_v16 = vld [vmem:[%s3135_s11] sm:$0xff]   ;;  %2549 = vmatprep.subr.bf16.mxu0 %v2935_v17  ;;  %2569 = vmatprep.subr.bf16.mxu1 %v2935_v17  ;;  %v2778_v18 = vld [vmem:[%s3135_s11 + $0x8] sm:$0xff]   ;;  %s3629_s11 = scalar_lea.vmem %s3562_s2, %s3113_s19  ;;  %s2937_s26 = smov 88   ;;  %vm955_vm4 = vcmask 1043456  }
  0x45   : > { %767 = vadd.xlane.f32.xlu0 %v766_v4  ;;  %2550 = vmatpush3.bf16.msra.mxu0 %v2777_v16  ;;  %v2434_v27 = vld [vmem:[%s3629_s11] ss:$0 sm:$0xff]  ;;  %s2938_s27 = smov 96   ;;  %s2939_s23 = smov 120   ;;  %vm1117_vm6 = vcmask 130112   ;;  %vm1234_vm7 = vcmask 195712  }
  0x46   : > { %2553 = vmatprep.mubr.msk.bf16.mxu0 %vm2936_vm2, %v2935_v17  ;;  %2551 = vmatprep.subr.bf16.mxu0 %v2935_v17  ;;  %v2435_v31 = vld [vmem:[%s3630_s24] ss:$0 sm:$0xff]  ;;  %s2940_s16 = smov 112   ;;  %s2941_s18 = smov 80   ;;  %vm1351_vm8 = vcmask 261312  }
  0x47   : > { %2571 = vmatprep.mubr.msk.bf16.mxu1 %vm2936_vm2, %v2935_v17  ;;  %v2436_v36 = vld [vmem:[%s3631_s15] ss:$0 sm:$0xff]  ;;  %s2942_s25 = smov 104   ;;  %s2943_s20 = smov 72  }
  0x48   : > { %s2944_s13 = smov 64   ;;  %s2945_s1 = smov 48  }
  0x49   : > { %770 = vadd.xlane.f32.xlu0 %v769_v5  ;;  %2552 = vmatpush3.bf16.msra.mxu0 %v2778_v18  ;;  %s2946_s6 = smov 56   ;;  %s2947_s11 = smov 40  }
  0x4a   : > { %2557 = vmatprep.subr.bf16.mxu0 %v2935_v17  ;;  %s2949_s14 = smov 16   ;;  %s2950_s21 = smov 24  }
  0x4b   : > { %s3634_s28 = sld [smem:[#allocation24_spill]] }
  0x51   : > { %s3635_s29 = scalar_lea.vmem %s3634_s28, %s3113_s19 }
  0xd2   : > { %v768_v6 = vpop.xlane.xlu0 %767 }
  0xd3   : > { %v773_v7 = vmul.f32 0.03125, %v768_v6 }
  0xd5   : > { %v775_v8 = vsub.f32 %v3180_v2, %v773_v7  ;;  %v758_v7 = vlaneseq }
  0xd6   : > { %v771_v9 = vpop.xlane.xlu0 %770 }
  0xd7   : > { %v774_v10 = vmul.f32 0.03125, %v771_v9  ;;  %v777_v11 = vmul.f32 %v775_v8, %v775_v8  ;;  %v761_v9 = vand.u32 127, %v758_v7 }
  0xd9   : > { %v776_v12 = vsub.f32 %v3182_v3, %v774_v10  ;;  %v779_v13 = vsel %vm765_vm1, %v777_v11, 0.0  ;;  %v2442_v10 = vld [vmem:[%s3118_s30] ss:$0 sm:$0xff] }
  0xda   : > { %780 = vadd.xlane.f32.xlu1 %v779_v13 }
  0xdb   : > { %v778_v14 = vmul.f32 %v776_v12, %v776_v12 }
  0xdd   : > { %v782_v15 = vsel %vm765_vm1, %v778_v14, 0.0 }
  0xde   : > { %783 = vadd.xlane.f32.xlu1 %v782_v15 }
 0x167   : > { %v781_v19 = vpop.xlane.xlu1 %780 }
 0x168   : > { %v785_v20 = vmul.f32 0.03125, %v781_v19 }
 0x16a   : > { %v787_v21 = vadd.f32 1e-05, %v785_v20 }
 0x16b   : > { %v784_v22 = vpop.xlane.xlu1 %783 }
 0x16c   : > { %2791 = vrsqrt.f32 %v787_v21  ;;  %v786_v23 = vmul.f32 0.03125, %v784_v22 }
 0x16e   : > { %v788_v24 = vadd.f32 1e-05, %v786_v23 }
 0x170   : > { %2793 = vrsqrt.f32 %v788_v24 }
 0x176   : > { %v2792_v25 = vpop.eup %2791 }
 0x177   : > { %v791_v26 = vmul.f32 %v2792_v25, %v775_v8  ;;  %v759_v8 = vshrl.u32 %v758_v7, 7 }
 0x179   : > { %v799_v30 = vmul.f32 %v2434_v27, %v791_v26  ;;  %vm3289_vm5 = vcmp.lt.s32.totalorder %v759_v8, %v761_v9 }
 0x17a   : > { %v2794_v28 = vpop.eup %2793 }
 0x17b   : > { %v792_v29 = vmul.f32 %v2794_v28, %v776_v12  ;;  %v807_v33 = vadd.f32 %v2435_v31, %v799_v30 }
 0x17d   : > { %v800_v32 = vmul.f32 %v2434_v27, %v792_v29 }
 0x17f   : > { %v808_v34 = vadd.f32 %v2435_v31, %v800_v32 }
 0x181   : > { %v809_v35 = vpack.c.bf16 %v808_v34, %v807_v33 }
 0x183   : > { %2554 = vmatmul.mubr.msk.bf16.vlgmr.msra.gmra.mrb[0].mxu0 %vm765_vm1, %v809_v35 }
 0x184   : > { %2559 = vmatprep.mubr.msk.bf16.mxu0 %vm2936_vm2, %v2935_v17 }
 0x256   : > { %v870_v37 = vpop.f32.mrb[0].mxu0 }
 0x257   : > { %v871_v38 = vadd.f32 %v2436_v36, %v870_v37  ;;  %v2555_v39 = vpop.f32.mrb[1].mxu0 }
 0x258   : > { %v873_v40 = vpop.f32.mrb[2].mxu0 }
 0x259   : > { %v3220_v41 = vpack.c.bf16 %v871_v38, %v871_v38  ;;  %v2556_v42 = vpop.f32.mrb[3].mxu0  ;;  %v874_v43 = vadd.f32 %v2436_v36, %v873_v40 }
 0x25b   : > { %1004 = vrot.lane.b32.xlu1 %v3220_v41, %s2937_s26  ;;  %890 = vrot.lane.b32.xlu0 %v3220_v41, %s2938_s27  ;;  %v3228_v44 = vpack.c.bf16 %v874_v43, %v874_v43 }
 0x25f   : > { %1002 = vrot.lane.b32.xlu1 %v3220_v41, %s2939_s23  ;;  %1119 = vrot.lane.b32.xlu0 %v3220_v41, %s2940_s16 }
 0x263   : > { %1121 = vrot.lane.b32.xlu1 %v3220_v41, %s2941_s18  ;;  %1236 = vrot.lane.b32.xlu0 %v3220_v41, %s2942_s25 }
 0x267   : > { %1238 = vrot.lane.b32.xlu1 %v3220_v41, %s2943_s20  ;;  %1474 = vrot.lane.b32.xlu0 %v3228_v44, %s2937_s26 }
 0x26b   : > { %1590 = vrot.lane.b32.xlu0 %v3228_v44, %s2941_s18  ;;  %1361 = vrot.lane.b32.xlu1 %v3228_v44, %s2938_s27  ;;  %s3636_s27 = sld [smem:[#allocation25_spill]] }
 0x26f   : > { %1706 = vrot.lane.b32.xlu0 %v3228_v44, %s2943_s20  ;;  %1472 = vrot.lane.b32.xlu1 %v3228_v44, %s2939_s23 }
 0x273   : > { %950 = vrot.lane.b32.xlu0 %v3220_v41, %s2944_s13  ;;  %1588 = vrot.lane.b32.xlu1 %v3228_v44, %s2940_s16 }
 0x277   : > { %1180 = vrot.lane.b32.xlu0 %v3220_v41, %s2945_s1  ;;  %1704 = vrot.lane.b32.xlu1 %v3228_v44, %s2942_s25 }
 0x27b   : > { %1063 = vrot.lane.b32.xlu1 %v3220_v41, %s2946_s6 }
 0x2cd   : > { %v1005_v45 = vpop.permute.xlu1 %1004  ;;  %v891_v46 = vpop.permute.xlu0 %890 }
 0x2ce   : > { %v897_v47 = vsel %vm892_vm3, %v891_v46, 0  ;;  %v1010_v48 = vsel %vm892_vm3, %v1005_v45, 0 }
 0x2cf   : > { %2558 = vmatpush3.bf16.xpose.msra.mxu0 %v897_v47  ;;  %2570 = vmatpush3.bf16.xpose.msra.mxu1 %v1010_v48 }
 0x2d0   : > { %2581 = vmatprep.subr.bf16.mxu1 %v2935_v17  ;;  %2563 = vmatprep.subr.bf16.mxu0 %v2935_v17 }
 0x2d1   : > { %v1003_v49 = vpop.permute.xlu1 %1002  ;;  %v1120_v50 = vpop.permute.xlu0 %1119 }
 0x2d5   : > { %v1122_v51 = vpop.permute.xlu1 %1121  ;;  %v1237_v52 = vpop.permute.xlu0 %1236 }
 0x2d6   : > { %v1127_v53 = vsel %vm892_vm3, %v1122_v51, 0  ;;  %2560 = vmatmul.mubr.msk.bf16.vlgmr.msra.gmra.mrb[4].mxu0 %vm892_vm3, %v3220_v41  ;;  %2572 = vmatmul.mubr.msk.bf16.vlgmr.msra.gmra.mrb[0].mxu1 %vm892_vm3, %v1003_v49  ;;  %v2452_v51 = vld [vmem:[%s3118_s30 + $0x1] ss:$0 sm:$0xff]  ;;  %s2948_s30 = smov 8  }
 0x2d7   : > { %2582 = vmatpush3.bf16.xpose.msra.mxu1 %v1127_v53  ;;  %2583 = vmatprep.mubr.msk.bf16.mxu1 %vm2936_vm2, %v2935_v17 }
 0x2d8   : > { %2593 = vmatprep.subr.bf16.mxu1 %v2935_v17  ;;  %2565 = vmatprep.mubr.msk.bf16.mxu0 %vm2936_vm2, %v2935_v17 }
 0x2d9   : > { %v1475_v54 = vpop.permute.xlu0 %1474  ;;  %v1239_v55 = vpop.permute.xlu1 %1238 }
 0x2da   : > { %v1244_v57 = vsel %vm892_vm3, %v1239_v55, 0  ;;  %v1480_v63 = vsel %vm892_vm3, %v1475_v54, 0 }
 0x2dd   : > { %v1591_v56 = vpop.permute.xlu0 %1590  ;;  %v1362_v59 = vpop.permute.xlu1 %1361 }
 0x2de   : > { %2584 = vmatmul.mubr.msk.bf16.vlgmr.msra.gmra.mrb[4].mxu1 %vm892_vm3, %v1120_v50  ;;  %v1367_v61 = vsel %vm892_vm3, %v1362_v59, 0  ;;  %v1596_v1 = vsel %vm892_vm3, %v1591_v56, 0 }
 0x2df   : > { %2594 = vmatpush3.bf16.xpose.msra.mxu1 %v1244_v57  ;;  %2595 = vmatprep.mubr.msk.bf16.mxu1 %vm2936_vm2, %v2935_v17 }
 0x2e0   : > { %2605 = vmatprep.subr.bf16.mxu1 %v2935_v17 }
 0x2e1   : > { %v1707_v58 = vpop.permute.xlu0 %1706  ;;  %v1473_v0 = vpop.permute.xlu1 %1472 }
 0x2e2   : > { %v1712_v5 = vsel %vm892_vm3, %v1707_v58, 0 }
 0x2e5   : > { %v951_v60 = vpop.permute.xlu0 %950  ;;  %v1589_v4 = vpop.permute.xlu1 %1588 }
 0x2e6   : > { %v957_v62 = vsel %vm955_vm4, %v951_v60, 0  ;;  %2596 = vmatmul.mubr.msk.bf16.vlgmr.msra.gmra.mrb[8].mxu1 %vm892_vm3, %v1237_v52 }
 0x2e7   : > { %2564 = vmatpush3.bf16.msra.mxu0 %v957_v62  ;;  %2606 = vmatpush3.bf16.xpose.msra.mxu1 %v1367_v61 }
 0x2e8   : > { %2607 = vmatprep.mubr.msk.bf16.mxu1 %vm2936_vm2, %v2935_v17  ;;  %2617 = vmatprep.subr.bf16.mxu1 %v2935_v17 }
 0x2e9   : > { %2575 = vmatprep.subr.bf16.mxu0 %v2935_v17  ;;  %v1705_v6 = vpop.permute.xlu1 %1704  ;;  %v1181_v9 = vpop.permute.xlu0 %1180 }
 0x2ee   : > { %2608 = vmatmul.mubr.msk.bf16.vlgmr.msra.gmra.mrb[12].mxu1 %vm892_vm3, %v3228_v44 }
 0x2ef   : > { %2618 = vmatpush3.bf16.xpose.msra.mxu1 %v1480_v63  ;;  %2619 = vmatprep.mubr.msk.bf16.mxu1 %vm2936_vm2, %v2935_v17 }
 0x2f0   : > { %2629 = vmatprep.subr.bf16.mxu1 %v2935_v17 }
 0x2f6   : > { %2620 = vmatmul.mubr.msk.bf16.vlgmr.msra.gmra.mrb[16].mxu1 %vm892_vm3, %v1473_v0 }
 0x2f7   : > { %2630 = vmatpush3.bf16.xpose.msra.mxu1 %v1596_v1  ;;  %2631 = vmatprep.mubr.msk.bf16.mxu1 %vm2936_vm2, %v2935_v17 }
 0x2f8   : > { %2641 = vmatprep.subr.bf16.mxu1 %v2935_v17 }
 0x2fe   : > { %2632 = vmatmul.mubr.msk.bf16.vlgmr.msra.gmra.mrb[20].mxu1 %vm892_vm3, %v1589_v4 }
 0x2ff   : > { %2642 = vmatpush3.bf16.xpose.msra.mxu1 %v1712_v5  ;;  %2643 = vmatprep.mubr.msk.bf16.mxu1 %vm2936_vm2, %v2935_v17 }
 0x300   : > { %2653 = vmatprep.subr.bf16.mxu1 %v2935_v17 }
 0x306   : > { %2644 = vmatmul.mubr.msk.bf16.vlgmr.msra.gmra.mrb[24].mxu1 %vm892_vm3, %v1705_v6 }
 0x307   : > { %2657 = vmatprep.mubr.msk.bf16.mxu1 %vm2936_vm2, %v2935_v17 }
 0x3a9   : > { %v933_v11 = vpop.f32.mrb[4].mxu0  ;;  %v1046_v12 = vpop.f32.mrb[0].mxu1 }
 0x3aa   : > { %v934_v14 = vadd.f32 %v2442_v10, %v933_v11  ;;  %v1047_v15 = vadd.f32 %v2442_v10, %v1046_v12  ;;  %v2561_v16 = vpop.f32.mrb[5].mxu0  ;;  %v2573_v18 = vpop.f32.mrb[1].mxu1 }
 0x3ab   : > { %v936_v19 = vpop.f32.mrb[6].mxu0  ;;  %v1049_v20 = vpop.f32.mrb[2].mxu1 }
 0x3ac   : > { %v2562_v21 = vpop.f32.mrb[7].mxu0  ;;  %v2574_v22 = vpop.f32.mrb[3].mxu1  ;;  %v3295_v23 = vsel %vm3289_vm5, -1e+09, %v1047_v15  ;;  %v3299_v24 = vsel %vm3289_vm5, -1e+09, %v934_v14 }
 0x3ad   : > { %v1053_v25 = vsel %vm892_vm3, %v3295_v23, -inf  ;;  %v940_v26 = vsel %vm892_vm3, %v3299_v24, -inf }
 0x3ae   : > { %1054 = vmax.xlane.f32.xlu1 %v1053_v25  ;;  %941 = vmax.xlane.f32.xlu0 %v940_v26 }
 0x3b1   : > { %v1163_v27 = vpop.f32.mrb[4].mxu1 }
 0x3b2   : > { %v1164_v28 = vadd.f32 %v2442_v10, %v1163_v27  ;;  %v2585_v29 = vpop.f32.mrb[5].mxu1 }
 0x3b3   : > { %v1166_v30 = vpop.f32.mrb[6].mxu1 }
 0x3b4   : > { %v2586_v31 = vpop.f32.mrb[7].mxu1  ;;  %v1169_v32 = vsel %vm3289_vm5, -1e+09, %v1164_v28 }
 0x3b5   : > { %v1170_v33 = vsel %vm892_vm3, %v1169_v32, -inf  ;;  %v1186_v31 = vsel %vm955_vm4, %v1181_v9, 0 }
 0x3b6   : > { %1171 = vmax.xlane.f32.xlu0 %v1170_v33 }
 0x3b9   : > { %v1280_v34 = vpop.f32.mrb[8].mxu1 }
 0x3ba   : > { %v1281_v35 = vadd.f32 %v2442_v10, %v1280_v34  ;;  %v2597_v36 = vpop.f32.mrb[9].mxu1  ;;  %v1064_v10 = vpop.permute.xlu1 %1063 }
 0x3bb   : > { %v1283_v37 = vpop.f32.mrb[10].mxu1 }
 0x3bc   : > { %v2598_v38 = vpop.f32.mrb[11].mxu1  ;;  %v3310_v39 = vsel %vm3289_vm5, -1e+09, %v1281_v35 }
 0x3bd   : > { %v1287_v40 = vsel %vm892_vm3, %v3310_v39, -inf }
 0x3be   : > { %1288 = vmax.xlane.f32.xlu0 %v1287_v40 }
 0x3bf   : > { %1420 = vrot.lane.b32.xlu1 %v3228_v44, %s2944_s13 }
 0x3c1   : > { %v1403_v42 = vpop.f32.mrb[12].mxu1 }
 0x3c2   : > { %v2609_v43 = vpop.f32.mrb[13].mxu1  ;;  %v1404_v61 = vadd.f32 %v2452_v51, %v1403_v42 }
 0x3c3   : > { %v1406_v45 = vpop.f32.mrb[14].mxu1 }
 0x3c4   : > { %v2610_v46 = vpop.f32.mrb[15].mxu1  ;;  %v3328_v4 = vsel %vm3289_vm5, -1e+09, %v1404_v61 }
 0x3c9   : > { %v1516_v47 = vpop.f32.mrb[16].mxu1 }
 0x3ca   : > { %v2621_v48 = vpop.f32.mrb[17].mxu1  ;;  %v1517_v1 = vadd.f32 %v2452_v51, %v1516_v47 }
 0x3cb   : > { %v1519_v49 = vpop.f32.mrb[18].mxu1 }
 0x3cc   : > { %v2622_v50 = vpop.f32.mrb[19].mxu1  ;;  %v3334_v5 = vsel %vm3289_vm5, -1e+09, %v1517_v1 }
 0x3cd   : > { %v1523_v6 = vsel %vm892_vm3, %v3334_v5, -inf }
 0x3d1   : > { %v1632_v52 = vpop.f32.mrb[20].mxu1 }
 0x3d2   : > { %v1633_v53 = vadd.f32 %v2452_v51, %v1632_v52  ;;  %v2633_v54 = vpop.f32.mrb[21].mxu1 }
 0x3d3   : > { %v1635_v55 = vpop.f32.mrb[22].mxu1 }
 0x3d4   : > { %v2634_v56 = vpop.f32.mrb[23].mxu1  ;;  %1297 = vrot.lane.b32.xlu0 %v3220_v41, %s2947_s11  ;;  %v3320_v57 = vsel %vm3289_vm5, -1e+09, %v1633_v53  ;;  %v1410_v41 = vsel %vm892_vm3, %v3328_v4, -inf }
 0x3d5   : > { %v1639_v7 = vsel %vm892_vm3, %v3320_v57, -inf }
 0x3d9   : > { %v1748_v58 = vpop.f32.mrb[24].mxu1 }
 0x3da   : > { %v1749_v59 = vadd.f32 %v2452_v51, %v1748_v58  ;;  %v2645_v60 = vpop.f32.mrb[25].mxu1 }
 0x3db   : > { %v1751_v62 = vpop.f32.mrb[26].mxu1 }
 0x3dc   : > { %v2646_v63 = vpop.f32.mrb[27].mxu1  ;;  %v3324_v0 = vsel %vm3289_vm5, -1e+09, %v1749_v59 }
 0x3dd   : > { %v1755_v8 = vsel %vm892_vm3, %v3324_v0, -inf }
 0x3e3   : > { %1411 = vmax.xlane.f32.xlu1 %v1410_v41 }
 0x3e7   : > { %1524 = vmax.xlane.f32.xlu1 %v1523_v6 }
 0x3f3   : > { %1640 = vmax.xlane.f32.xlu0 %v1639_v7 }
 0x3f8   : > { %1533 = vrot.lane.b32.xlu1 %v3228_v44, %s2946_s6 }
 0x409   : > { %1649 = vrot.lane.b32.xlu0 %v3228_v44, %s2945_s1  ;;  %s3640_s1 = sld [smem:[#allocation10_spill]] }
 0x40f   : > { %p2480_p1 = scmp.ne.s32.totalorder %s3640_s1, 1 }
 0x410   : > { %s3641_s6 = sld [smem:[#allocation29_spill]] (!%p2480_p1)  ;;  %vm2197_vm9 = vcmask (!%p2480_p1), 257024  }
 0x41c   : > { %1756 = vmax.xlane.f32.xlu1 %v1755_v8 }
 0x42d   : > { %1765 = vrot.lane.b32.xlu1 %v3228_v44, %s2947_s11 }
 0x43b   : > { %v1055_v11 = vpop.xlane.xlu1 %1054  ;;  %v942_v12 = vpop.xlane.xlu0 %941 }
 0x43c   : > { %v1056_v13 = vsub.f32 %v3295_v23, %v1055_v11  ;;  %v943_v14 = vsub.f32 %v3299_v24, %v942_v12  ;;  %v1069_v24 = vsel %vm955_vm4, %v1064_v10, 0 }
 0x43e   : > { %v1057_v15 = vmul.f32 1.442695, %v1056_v13  ;;  %v944_v16 = vmul.f32 1.442695, %v943_v14 }
 0x43f   : > { %v1421_v36 = vpop.permute.xlu1 %1420 }
 0x440   : > { %2795 = vpow2.f32 %v1057_v15  ;;  %v1426_v38 = vsel %vm955_vm4, %v1421_v36, 0 }
 0x441   : > { %2797 = vpow2.f32 %v944_v16 }
 0x443   : > { %v1172_v18 = vpop.xlane.xlu0 %1171 }
 0x444   : > { %v1173_v19 = vsub.f32 %v1169_v32, %v1172_v18 }
 0x446   : > { %v1174_v20 = vmul.f32 1.442695, %v1173_v19 }
 0x448   : > { %2799 = vpow2.f32 %v1174_v20 }
 0x44a   : > { %v2796_v21 = vpop.eup %2795 }
 0x44b   : > { %v3349_v22 = vpop.eup %2797  ;;  %v1059_v44 = vsel %vm892_vm3, %v2796_v21, 0.0  ;;  %v1289_v25 = vpop.xlane.xlu0 %1288  ;;  %v1062_v30 = vpack.c.bf16 %v2796_v21, %v2796_v21 }
 0x44c   : > { %1060 = vadd.xlane.f32.xlu0 %v1059_v44  ;;  %v949_v23 = vpack.c.bf16 %v3349_v22, %v3349_v22  ;;  %v1290_v26 = vsub.f32 %v3310_v39, %v1289_v25  ;;  %v946_v63 = vsel %vm892_vm3, %v3349_v22, 0.0 }
 0x44e   : > { %2566 = vmatmul.mubr.msk.bf16.vlgmr.msra.gmra.mrb[8].mxu0 %vm892_vm3, %v949_v23  ;;  %v1291_v28 = vmul.f32 1.442695, %v1290_v26 }
 0x44f   : > { %2576 = vmatpush3.bf16.msra.mxu0 %v1069_v24  ;;  %2577 = vmatprep.mubr.msk.bf16.mxu0 %vm2936_vm2, %v2935_v17  ;;  %v1298_v32 = vpop.permute.xlu0 %1297 }
 0x450   : > { %2587 = vmatprep.subr.bf16.mxu0 %v2935_v17  ;;  %2801 = vpow2.f32 %v1291_v28  ;;  %v1303_v34 = vsel %vm955_vm4, %v1298_v32, 0 }
 0x452   : > { %v2800_v27 = vpop.eup %2799 }
 0x453   : > { %v1176_v29 = vsel %vm892_vm3, %v2800_v27, 0.0  ;;  %v1179_v33 = vpack.c.bf16 %v2800_v27, %v2800_v27 }
 0x454   : > { %1177 = vadd.xlane.f32.xlu0 %v1176_v29 }
 0x456   : > { %2578 = vmatmul.mubr.msk.bf16.vlgmr.msra.gmra.mrb[12].mxu0 %vm892_vm3, %v1062_v30 }
 0x457   : > { %2588 = vmatpush3.bf16.msra.mxu0 %v1186_v31  ;;  %2589 = vmatprep.mubr.msk.bf16.mxu0 %vm2936_vm2, %v2935_v17 }
 0x458   : > { %2599 = vmatprep.subr.bf16.mxu0 %v2935_v17 }
 0x45a   : > { %v2802_v35 = vpop.eup %2801 }
 0x45b   : > { %v1296_v37 = vpack.c.bf16 %v2802_v35, %v2802_v35  ;;  %v1293_v62 = vsel %vm892_vm3, %v2802_v35, 0.0 }
 0x45e   : > { %2590 = vmatmul.mubr.msk.bf16.vlgmr.msra.gmra.mrb[16].mxu0 %vm892_vm3, %v1179_v33 }
 0x45f   : > { %2600 = vmatpush3.bf16.msra.mxu0 %v1303_v34  ;;  %2601 = vmatprep.mubr.msk.bf16.mxu0 %vm2936_vm2, %v2935_v17 }
 0x460   : > { %2611 = vmatprep.subr.bf16.mxu0 %v2935_v17 }
 0x466   : > { %2602 = vmatmul.mubr.msk.bf16.vlgmr.msra.gmra.mrb[20].mxu0 %vm892_vm3, %v1296_v37 }
 0x467   : > { %2612 = vmatpush3.bf16.msra.mxu0 %v1426_v38  ;;  %2613 = vmatprep.mubr.msk.bf16.mxu0 %vm2936_vm2, %v2935_v17 }
 0x468   : > { %2623 = vmatprep.subr.bf16.mxu0 %v2935_v17 }
 0x470   : > { %v1412_v39 = vpop.xlane.xlu1 %1411 }
 0x471   : > { %v1413_v40 = vsub.f32 %v3328_v4, %v1412_v39 }
 0x473   : > { %v1414_v42 = vmul.f32 1.442695, %v1413_v40 }
 0x474   : > { %v1525_v43 = vpop.xlane.xlu1 %1524 }
 0x475   : > { %2803 = vpow2.f32 %v1414_v42  ;;  %v1526_v45 = vsub.f32 %v3334_v5, %v1525_v43 }
 0x477   : > { %v1527_v46 = vmul.f32 1.442695, %v1526_v45 }
 0x478   : > { %v1534_v48 = vpop.permute.xlu1 %1533 }
 0x479   : > { %2805 = vpow2.f32 %v1527_v46  ;;  %v1539_v52 = vsel %vm955_vm4, %v1534_v48, 0 }
 0x47f   : > { %v2804_v47 = vpop.eup %2803 }
 0x480   : > { %v1641_v49 = vpop.xlane.xlu0 %1640  ;;  %v1419_v50 = vpack.c.bf16 %v2804_v47, %v2804_v47 }
 0x481   : > { %v1642_v51 = vsub.f32 %v3320_v57, %v1641_v49 }
 0x482   : > { %2614 = vmatmul.mubr.msk.bf16.vlgmr.msra.gmra.mrb[24].mxu0 %vm892_vm3, %v1419_v50 }
 0x483   : > { %v2806_v53 = vpop.eup %2805  ;;  %v1643_v54 = vmul.f32 1.442695, %v1642_v51  ;;  %2624 = vmatpush3.bf16.msra.mxu0 %v1539_v52  ;;  %2625 = vmatprep.mubr.msk.bf16.mxu0 %vm2936_vm2, %v2935_v17 }
 0x484   : > { %v1529_v55 = vsel %vm892_vm3, %v2806_v53, 0.0  ;;  %2635 = vmatprep.subr.bf16.mxu0 %v2935_v17  ;;  %v1650_v56 = vpop.permute.xlu0 %1649  ;;  %v1532_v58 = vpack.c.bf16 %v2806_v53, %v2806_v53 }
 0x485   : > { %2807 = vpow2.f32 %v1643_v54  ;;  %1530 = vadd.xlane.f32.xlu1 %v1529_v55  ;;  %v1655_v57 = vsel %vm955_vm4, %v1650_v56, 0 }
 0x48a   : > { %2626 = vmatmul.mubr.msk.bf16.vlgmr.msra.gmra.mrb[28].mxu0 %vm892_vm3, %v1532_v58 }
 0x48b   : > { %2636 = vmatpush3.bf16.msra.mxu0 %v1655_v57  ;;  %2637 = vmatprep.mubr.msk.bf16.mxu0 %vm2936_vm2, %v2935_v17 }
 0x48c   : > { %2647 = vmatprep.subr.bf16.mxu0 %v2935_v17 }
 0x48f   : > { %v2808_v59 = vpop.eup %2807 }
 0x490   : > { %v1645_v60 = vsel %vm892_vm3, %v2808_v59, 0.0  ;;  %v1648_v61 = vpack.c.bf16 %v2808_v59, %v2808_v59 }
 0x491   : > { %1646 = vadd.xlane.f32.xlu0 %v1645_v60 }
 0x492   : > { %2638 = vmatmul.mubr.msk.bf16.vlgmr.msra.gmra.mrb[32].mxu0 %vm892_vm3, %v1648_v61 }
 0x493   : > { %2649 = vmatprep.mubr.msk.bf16.mxu0 %vm2936_vm2, %v2935_v17 }
 0x495   : > { %1294 = vadd.xlane.f32.xlu0 %v1293_v62  ;;  %v2779_v62 = vld [vmem:[%s3144_s0] sm:$0xff]  }
 0x496   : > { %2654 = vmatpush3.bf16.msra.mxu1 %v2779_v62  ;;  %v2789_v62 = vld [vmem:[%s3175_s8 + $0x30] sm:$0xff]  }
 0x497   : > { %2655 = vmatprep.subr.bf16.mxu1 %v2935_v17 }
 0x499   : > { %947 = vadd.xlane.f32.xlu0 %v946_v63  ;;  %v2780_v63 = vld [vmem:[%s3144_s0 + $0x8] sm:$0xff]  }
 0x49a   : > { %2656 = vmatpush3.bf16.msra.mxu1 %v2780_v63  ;;  %v2790_v63 = vld [vmem:[%s3175_s8 + $0x38] sm:$0xff]  }
 0x49b   : > { %2669 = vmatprep.subr.bf16.mxu1 %v2935_v17 }
 0x4a9   : > { %v1757_v1 = vpop.xlane.xlu1 %1756 }
 0x4aa   : > { %v1758_v4 = vsub.f32 %v3324_v0, %v1757_v1  ;;  %v1416_v0 = vsel %vm892_vm3, %v2804_v47, 0.0 }
 0x4ac   : > { %v1759_v41 = vmul.f32 1.442695, %v1758_v4 }
 0x4ad   : > { %v1766_v5 = vpop.permute.xlu1 %1765 }
 0x4ae   : > { %2809 = vpow2.f32 %v1759_v41  ;;  %v1771_v6 = vsel %vm955_vm4, %v1766_v5, 0 }
 0x4af   : > { %2648 = vmatpush3.bf16.msra.mxu0 %v1771_v6 }
 0x4b0   : > { %2661 = vmatprep.subr.bf16.mxu0 %v2935_v17 }
 0x4b8   : > { %v2810_v7 = vpop.eup %2809 }
 0x4b9   : > { %v1761_v8 = vsel %vm892_vm3, %v2810_v7, 0.0  ;;  %v1764_v9 = vpack.c.bf16 %v2810_v7, %v2810_v7 }
 0x4ba   : > { %1762 = vadd.xlane.f32.xlu1 %v1761_v8 }
 0x4bb   : > { %2650 = vmatmul.mubr.msk.bf16.vlgmr.msra.gmra.mrb[36].mxu0 %vm892_vm3, %v1764_v9 }
 0x4bc   : > { %2665 = vmatprep.mubr.msk.bf16.mxu0 %vm2936_vm2, %v2935_v17 }
 0x4be   : > { %1417 = vadd.xlane.f32.xlu1 %v1416_v0 }
 0x4d9   : > { %v1061_v10 = vpop.xlane.xlu0 %1060 }
 0x4da   : > { %2811 = vrcp.f32 %v1061_v10 }
 0x4e1   : > { %v1178_v11 = vpop.xlane.xlu0 %1177 }
 0x4e2   : > { %2813 = vrcp.f32 %v1178_v11 }
 0x4e4   : > { %v2812_v20 = vpop.eup %2811 }
 0x4ec   : > { %v2814_v24 = vpop.eup %2813 }
 0x512   : > { %v1531_v39 = vpop.xlane.xlu1 %1530 }
 0x51e   : > { %v1647_v12 = vpop.xlane.xlu0 %1646 }
 0x521   : > { %v993_v13 = vpop.f32.mrb[8].mxu0 }
 0x522   : > { %v2567_v14 = vpop.f32.mrb[9].mxu0  ;;  %v1295_v15 = vpop.xlane.xlu0 %1294 }
 0x523   : > { %v996_v16 = vpop.f32.mrb[10].mxu0 }
 0x524   : > { %v2568_v18 = vpop.f32.mrb[11].mxu0  ;;  %v2461_v16 = vld [vmem:[%s3635_s29] ss:$0 sm:$0xff] }
 0x526   : > { %v948_v19 = vpop.xlane.xlu0 %947 }
 0x527   : > { %2815 = vrcp.f32 %v948_v19 }
 0x528   : > { %2817 = vrcp.f32 %v1295_v15 }
 0x529   : > { %v1105_v21 = vpop.f32.mrb[12].mxu0 }
 0x52a   : > { %v1112_v22 = vmul.f32 %v2812_v20, %v1105_v21  ;;  %v2579_v44 = vpop.f32.mrb[13].mxu0 }
 0x52b   : > { %v1108_v25 = vpop.f32.mrb[14].mxu0 }
 0x52c   : > { %1114 = vrot.lane.b32.xlu0 %v1112_v22, %s2948_s30  ;;  %v2580_v23 = vpop.f32.mrb[15].mxu0 }
 0x531   : > { %v2816_v26 = vpop.eup %2815  ;;  %v1222_v27 = vpop.f32.mrb[16].mxu0 }
 0x532   : > { %v1229_v28 = vmul.f32 %v2814_v24, %v1222_v27  ;;  %v2591_v29 = vpop.f32.mrb[17].mxu0  ;;  %v1000_v30 = vmul.f32 %v2816_v26, %v993_v13  ;;  %v2818_v33 = vpop.eup %2817 }
 0x533   : > { %v1225_v31 = vpop.f32.mrb[18].mxu0 }
 0x534   : > { %1231 = vrot.lane.b32.xlu1 %v1229_v28, %s2949_s14  ;;  %v2592_v32 = vpop.f32.mrb[19].mxu0  ;;  %1001 = vst.msk [vmem:[#allocation3] sm:$0xff] %vm892_vm3, %v1000_v30 }
 0x539   : > { %v1339_v34 = vpop.f32.mrb[20].mxu0 }
 0x53a   : > { %v1346_v35 = vmul.f32 %v2818_v33, %v1339_v34  ;;  %v2603_v36 = vpop.f32.mrb[21].mxu0 }
 0x53b   : > { %v1342_v37 = vpop.f32.mrb[22].mxu0  ;;  %v2782_v36 = vld [vmem:[%s3161_s17 + $0x8] sm:$0xff]  }
 0x53c   : > { %1348 = vrot.lane.b32.xlu0 %v1346_v35, %s2950_s21  ;;  %v2604_v38 = vpop.f32.mrb[23].mxu0  ;;  %v2781_v35 = vld [vmem:[%s3161_s17] sm:$0xff]   ;;  %s3637_s17 = scalar_lea.vmem %s3636_s27, %s3113_s19 }
 0x53d   : > { %2662 = vmatpush3.bf16.msra.mxu0 %v2781_v35 }
 0x53e   : > { %2663 = vmatprep.subr.bf16.mxu0 %v2935_v17 }
 0x541   : > { %2664 = vmatpush3.bf16.msra.mxu0 %v2782_v36 }
 0x547   : > { %v1763_v40 = vpop.xlane.xlu1 %1762 }
 0x54b   : > { %v1418_v42 = vpop.xlane.xlu1 %1417 }
 0x54c   : > { %2819 = vrcp.f32 %v1418_v42 }
 0x54d   : > { %2821 = vrcp.f32 %v1531_v39 }
 0x54e   : > { %2823 = vrcp.f32 %v1647_v12 }
 0x54f   : > { %2825 = vrcp.f32 %v1763_v40 }
 0x555   : > { %v1462_v43 = vpop.f32.mrb[24].mxu0 }
 0x556   : > { %v2820_v45 = vpop.eup %2819  ;;  %v2615_v46 = vpop.f32.mrb[25].mxu0 }
 0x557   : > { %v1469_v47 = vmul.f32 %v2820_v45, %v1462_v43  ;;  %v1465_v48 = vpop.f32.mrb[26].mxu0  ;;  %v2822_v50 = vpop.eup %2821 }
 0x558   : > { %v2616_v49 = vpop.f32.mrb[27].mxu0  ;;  %v2824_v56 = vpop.eup %2823 }
 0x559   : > { %1471 = vst.msk [vmem:[#allocation3 + $0x8] sm:$0xff] %vm892_vm3, %v1469_v47  ;;  %v2826_v1 = vpop.eup %2825  ;;  %v2465_v47 = vld [vmem:[%s3637_s17] ss:$0 sm:$0xff] }
 0x55d   : > { %v1575_v51 = vpop.f32.mrb[28].mxu0 }
 0x55e   : > { %v1582_v52 = vmul.f32 %v2822_v50, %v1575_v51  ;;  %v2627_v53 = vpop.f32.mrb[29].mxu0  ;;  %v2466_v51 = vld [vmem:[%s728_s22] ss:$0 sm:$0xff] }
 0x55f   : > { %v1578_v54 = vpop.f32.mrb[30].mxu0 }
 0x560   : > { %1584 = vrot.lane.b32.xlu1 %v1582_v52, %s2948_s30  ;;  %v2628_v55 = vpop.f32.mrb[31].mxu0 }
 0x565   : > { %v1691_v58 = vpop.f32.mrb[32].mxu0 }
 0x566   : > { %v1698_v57 = vmul.f32 %v2824_v56, %v1691_v58  ;;  %v2639_v59 = vpop.f32.mrb[33].mxu0  ;;  %v2783_v56 = vld [vmem:[%s3175_s8] sm:$0xff]   ;;  %v2784_v58 = vld [vmem:[%s3175_s8 + $0x8] sm:$0xff]  }
 0x567   : > { %v1694_v60 = vpop.f32.mrb[34].mxu0  ;;  %v2786_v59 = vld [vmem:[%s3175_s8 + $0x18] sm:$0xff]  }
 0x568   : > { %1700 = vrot.lane.b32.xlu1 %v1698_v57, %s2949_s14  ;;  %v2640_v61 = vpop.f32.mrb[35].mxu0  ;;  %v2785_v57 = vld [vmem:[%s3175_s8 + $0x10] sm:$0xff]   ;;  %v2787_v60 = vld [vmem:[%s3175_s8 + $0x20] sm:$0xff]   ;;  %s3642_s14 = sld [smem:[#allocation30_spill]] (!%p2480_p1) }
 0x569   : > { %v2788_v61 = vld [vmem:[%s3175_s8 + $0x28] sm:$0xff]  }
 0x58e   : > { %v1807_v4 = vpop.f32.mrb[36].mxu0 }
 0x58f   : > { %v1814_v41 = vmul.f32 %v2826_v1, %v1807_v4  ;;  %v2651_v5 = vpop.f32.mrb[37].mxu0  ;;  %v2467_v1 = vld [vmem:[%s736_s4] ss:$0 sm:$0xff] }
 0x590   : > { %v1810_v6 = vpop.f32.mrb[38].mxu0 }
 0x591   : > { %1816 = vrot.lane.b32.xlu1 %v1814_v41, %s2950_s21  ;;  %v2652_v7 = vpop.f32.mrb[39].mxu0 }
 0x59e   : > { %v1115_v8 = vpop.permute.xlu0 %1114 }
 0x59f   : > { %1118 = vst.msk [vmem:[#allocation3] sm:$0xff] %vm1117_vm6, %v1115_v8 }
 0x5a6   : > { %v1232_v9 = vpop.permute.xlu1 %1231 }
 0x5a7   : > { %1235 = vst.msk [vmem:[#allocation3] sm:$0xff] %vm1234_vm7, %v1232_v9 }
 0x5ae   : > { %v1349_v0 = vpop.permute.xlu0 %1348 }
 0x5af   : > { %1352 = vst.msk [vmem:[#allocation3] sm:$0xff] %vm1351_vm8, %v1349_v0 }
 0x5b6   : > { %v1820_v13 = vld [vmem:[#allocation3] sm:$0xff] }
 0x5d2   : > { %v1585_v10 = vpop.permute.xlu1 %1584 }
 0x5d3   : > { %1587 = vst.msk [vmem:[#allocation3 + $0x8] sm:$0xff] %vm1117_vm6, %v1585_v10 }
 0x5da   : > { %v1701_v11 = vpop.permute.xlu1 %1700 }
 0x5db   : > { %1703 = vst.msk [vmem:[#allocation3 + $0x8] sm:$0xff] %vm1234_vm7, %v1701_v11 }
 0x603   : > { %v1817_v12 = vpop.permute.xlu1 %1816 }
 0x604   : > { %1819 = vst.msk [vmem:[#allocation3 + $0x8] sm:$0xff] %vm1351_vm8, %v1817_v12 }
 0x60b   : > { %v1821_v14 = vld [vmem:[#allocation3 + $0x8] sm:$0xff] }
 0x60c   : > { %v1822_v15 = vpack.c.bf16 %v1821_v14, %v1820_v13 }
 0x60e   : > { %2658 = vmatmul.mubr.msk.bf16.vlgmr.msra.gmra.mrb[28].mxu1 %vm765_vm1, %v1822_v15 }
 0x60f   : > { %2685 = vmatprep.mubr.msk.bf16.mxu1 %vm2936_vm2, %v2935_v17  ;;  %2670 = vmatpush3.bf16.msra.mxu1 %v2783_v56  ;;  %v2482_v56 = vld [vmem:[%s3642_s14] ss:$0 sm:$0xff] (!%p2480_p1) }
 0x610   : > { %2671 = vmatprep.subr.bf16.mxu1 %v2935_v17 }
 0x613   : > { %2672 = vmatpush3.bf16.msra.mxu1 %v2784_v58 }
 0x614   : > { %2673 = vmatprep.subr.bf16.mxu1 %v2935_v17 }
 0x617   : > { %2674 = vmatpush3.bf16.msra.mxu1 %v2785_v57 }
 0x618   : > { %2675 = vmatprep.subr.bf16.mxu1 %v2935_v17 }
 0x61b   : > { %2676 = vmatpush3.bf16.msra.mxu1 %v2786_v59 }
 0x61c   : > { %2677 = vmatprep.subr.bf16.mxu1 %v2935_v17 }
 0x61f   : > { %2678 = vmatpush3.bf16.msra.mxu1 %v2787_v60 }
 0x620   : > { %2679 = vmatprep.subr.bf16.mxu1 %v2935_v17 }
 0x623   : > { %2680 = vmatpush3.bf16.msra.mxu1 %v2788_v61 }
 0x624   : > { %2681 = vmatprep.subr.bf16.mxu1 %v2935_v17 }
 0x627   : > { %2682 = vmatpush3.bf16.msra.mxu1 %v2789_v62 }
 0x628   : > { %2683 = vmatprep.subr.bf16.mxu1 %v2935_v17 }
 0x62b   : > { %2684 = vmatpush3.bf16.msra.mxu1 %v2790_v63 }
 0x6e1   : > { %v1883_v18 = vpop.f32.mrb[28].mxu1 }
 0x6e2   : > { %v1884_v19 = vadd.f32 %v2461_v16, %v1883_v18  ;;  %v2659_v20 = vpop.f32.mrb[29].mxu1 }
 0x6e3   : > { %v1886_v21 = vpop.f32.mrb[30].mxu1 }
 0x6e4   : > { %v3426_v22 = vadd.f32 %v1884_v19, %v3180_v2  ;;  %v1887_v44 = vadd.f32 %v2461_v16, %v1886_v21  ;;  %v2660_v25 = vpop.f32.mrb[31].mxu1 }
 0x6e6   : > { %v3429_v23 = vadd.f32 %v1887_v44, %v3182_v3  ;;  %v1894_v24 = vsel %vm765_vm1, %v3426_v22, 0.0 }
 0x6e7   : > { %1895 = vadd.xlane.f32.xlu0 %v1894_v24 }
 0x6e8   : > { %v1897_v26 = vsel %vm765_vm1, %v3429_v23, 0.0 }
 0x6e9   : > { %1898 = vadd.xlane.f32.xlu1 %v1897_v26 }
 0x774   : > { %v1896_v27 = vpop.xlane.xlu0 %1895 }
 0x775   : > { %v1900_v28 = vmul.f32 0.03125, %v1896_v27 }
 0x776   : > { %v1899_v29 = vpop.xlane.xlu1 %1898 }
 0x777   : > { %v1902_v2 = vsub.f32 %v3426_v22, %v1900_v28  ;;  %v1901_v30 = vmul.f32 0.03125, %v1899_v29  ;;  %v2479_v29 = vld [vmem:[%s744_s7] ss:$0 sm:$0xff] }
 0x779   : > { %v1903_v31 = vsub.f32 %v3429_v23, %v1901_v30  ;;  %v1904_v3 = vmul.f32 %v1902_v2, %v1902_v2 }
 0x77b   : > { %v1906_v32 = vsel %vm765_vm1, %v1904_v3, 0.0  ;;  %v1905_v33 = vmul.f32 %v1903_v31, %v1903_v31 }
 0x77c   : > { %1907 = vadd.xlane.f32.xlu0 %v1906_v32 }
 0x77d   : > { %v1909_v34 = vsel %vm765_vm1, %v1905_v33, 0.0 }
 0x780   : > { %1910 = vadd.xlane.f32.xlu0 %v1909_v34 }
 0x809   : > { %v1908_v37 = vpop.xlane.xlu0 %1907 }
 0x80a   : > { %v1912_v38 = vmul.f32 0.03125, %v1908_v37 }
 0x80c   : > { %v1914_v39 = vadd.f32 1e-05, %v1912_v38 }
 0x80d   : > { %v1911_v40 = vpop.xlane.xlu0 %1910 }
 0x80e   : > { %2827 = vrsqrt.f32 %v1914_v39  ;;  %v1913_v42 = vmul.f32 0.03125, %v1911_v40 }
 0x810   : > { %v1915_v43 = vadd.f32 1e-05, %v1913_v42 }
 0x812   : > { %2829 = vrsqrt.f32 %v1915_v43 }
 0x818   : > { %v2828_v45 = vpop.eup %2827 }
 0x819   : > { %v1918_v46 = vmul.f32 %v2828_v45, %v1902_v2 }
 0x81b   : > { %v1926_v49 = vmul.f32 %v2465_v47, %v1918_v46 }
 0x81c   : > { %v2830_v48 = vpop.eup %2829 }
 0x81d   : > { %v1919_v50 = vmul.f32 %v2830_v48, %v1903_v31  ;;  %v1934_v53 = vadd.f32 %v2466_v51, %v1926_v49 }
 0x81f   : > { %v1927_v52 = vmul.f32 %v2465_v47, %v1919_v50 }
 0x821   : > { %v1935_v54 = vadd.f32 %v2466_v51, %v1927_v52 }
 0x823   : > { %v1936_v55 = vpack.c.bf16 %v1935_v54, %v1934_v53  ;;  %v2481_v54 = vld [vmem:[%s3641_s6] ss:$0 sm:$0xff] (!%p2480_p1) }
 0x825   : > { %2666 = vmatmul.mubr.msk.bf16.vlgmr.msra.gmra.mrb[40].mxu0 %vm765_vm1, %v1936_v55 }
 0x8f8   : > { %v1997_v4 = vpop.f32.mrb[40].mxu0 }
 0x8f9   : > { %v1998_v41 = vadd.f32 %v2467_v1, %v1997_v4  ;;  %v2667_v5 = vpop.f32.mrb[41].mxu0 }
 0x8fa   : > { %v2000_v6 = vpop.f32.mrb[42].mxu0 }
 0x8fb   : > { %v2006_v7 = vmul.f32 0.044715, %v1998_v41  ;;  %v2001_v8 = vadd.f32 %v2467_v1, %v2000_v6  ;;  %v2668_v9 = vpop.f32.mrb[43].mxu0  ;;  %v2004_v21 = vmul.f32 0.5, %v1998_v41 }
 0x8fd   : > { %v2008_v0 = vmul.f32 %v2006_v7, %v1998_v41  ;;  %v2007_v10 = vmul.f32 0.044715, %v2001_v8  ;;  %v2005_v44 = vmul.f32 0.5, %v2001_v8 }
 0x8ff   : > { %v2010_v11 = vmul.f32 %v2008_v0, %v1998_v41  ;;  %v2009_v12 = vmul.f32 %v2007_v10, %v2001_v8 }
 0x901   : > { %v2012_v13 = vadd.f32 %v2010_v11, %v1998_v41  ;;  %v2011_v14 = vmul.f32 %v2009_v12, %v2001_v8 }
 0x903   : > { %v2014_v17 = vmul.f32 0.7978846, %v2012_v13  ;;  %v2013_v15 = vadd.f32 %v2011_v14, %v2001_v8 }
 0x905   : > { %2831 = vtanh.f32 %v2014_v17  ;;  %v2015_v16 = vmul.f32 0.7978846, %v2013_v15 }
 0x907   : > { %2833 = vtanh.f32 %v2015_v16 }
 0x90f   : > { %v2832_v18 = vpop.eup %2831 }
 0x910   : > { %v2018_v19 = vadd.f32 1.0, %v2832_v18 }
 0x911   : > { %v2834_v20 = vpop.eup %2833 }
 0x912   : > { %v2019_v25 = vadd.f32 1.0, %v2834_v20  ;;  %v2020_v24 = vmul.f32 %v2018_v19, %v2004_v21 }
 0x914   : > { %v2021_v26 = vmul.f32 %v2019_v25, %v2005_v44 }
 0x916   : > { %v2022_v27 = vpack.c.bf16 %v2021_v26, %v2020_v24 }
 0x918   : > { %2686 = vmatmul.mubr.bf16.vlgmr.msra.gmra.mrb[32].mxu1 %v2022_v27 }
 0x9eb   : > { %v2121_v28 = vpop.f32.mrb[32].mxu1 }
 0x9ec   : > { %v2128_v2 = vadd.f32 %v2121_v28, %v3426_v22  ;;  %v2687_v30 = vpop.f32.mrb[33].mxu1  ;;  %2144 = sbr.rel (%p2480_p1) target bundleno = 2864 (0xb30), region = 92 }
 0x9ed   : > { %v2124_v31 = vpop.f32.mrb[34].mxu1 }
 0x9ee   : > { %v2137_v3 = vadd.f32 %v2479_v29, %v2128_v2  ;;  %v2129_v32 = vadd.f32 %v2124_v31, %v3429_v23  ;;  %v2688_v33 = vpop.f32.mrb[35].mxu1 }
 0x9f0   : > { %2139 = vst.msk [vmem:[#allocation2] sm:$0xff] %vm765_vm1, %v2137_v3  ;;  %v2138_v34 = vadd.f32 %v2479_v29, %v2129_v32  ;;  %v2147_v35 = vsel (!%p2480_p1), %vm765_vm1, %v2137_v3, 0.0 }
 0x9f1   : > { %2148 = vadd.xlane.f32.xlu0 (!%p2480_p1), %v2147_v35 }
 0x9f2   : > { %2140 = vst.msk [vmem:[#allocation2 + $0x8] sm:$0xff] %vm765_vm1, %v2138_v34  ;;  %v2150_v36 = vsel (!%p2480_p1), %vm765_vm1, %v2138_v34, 0.0 }
 0x9f5   : > { %2151 = vadd.xlane.f32.xlu0 %v2150_v36 }
 0xa7e   : > { %v2149_v22 = vpop.xlane.xlu0 %2148 }
 0xa7f   : > { %v2153_v37 = vmul.f32 0.03125, %v2149_v22 }
 0xa81   : > { %v2155_v38 = vsub.f32 %v2137_v3, %v2153_v37 }
 0xa82   : > { %v2152_v39 = vpop.xlane.xlu0 %2151 }
 0xa83   : > { %v2154_v23 = vmul.f32 0.03125, %v2152_v39  ;;  %v2157_v40 = vmul.f32 %v2155_v38, %v2155_v38 }
 0xa85   : > { %v2156_v42 = vsub.f32 %v2138_v34, %v2154_v23  ;;  %v2159_v43 = vsel %vm765_vm1, %v2157_v40, 0.0 }
 0xa86   : > { %2160 = vadd.xlane.f32.xlu1 %v2159_v43 }
 0xa87   : > { %v2158_v45 = vmul.f32 %v2156_v42, %v2156_v42 }
 0xa89   : > { %v2162_v46 = vsel %vm765_vm1, %v2158_v45, 0.0 }
 0xa8a   : > { %2163 = vadd.xlane.f32.xlu1 %v2162_v46 }
 0xb13   : > { %v2161_v47 = vpop.xlane.xlu1 %2160 }
 0xb14   : > { %v2165_v48 = vmul.f32 0.03125, %v2161_v47 }
 0xb16   : > { %v2167_v49 = vadd.f32 1e-05, %v2165_v48 }
 0xb17   : > { %v2164_v50 = vpop.xlane.xlu1 %2163 }
 0xb18   : > { %2835 = vrsqrt.f32 %v2167_v49  ;;  %v2166_v51 = vmul.f32 0.03125, %v2164_v50 }
 0xb1a   : > { %v2168_v52 = vadd.f32 1e-05, %v2166_v51 }
 0xb1c   : > { %2837 = vrsqrt.f32 %v2168_v52 }
 0xb22   : > { %v2836_v53 = vpop.eup %2835 }
 0xb23   : > { %v2171_v55 = vmul.f32 %v2836_v53, %v2155_v38 }
 0xb25   : > { %v2179_v58 = vmul.f32 %v2481_v54, %v2171_v55 }
 0xb26   : > { %v2838_v57 = vpop.eup %2837 }
 0xb27   : > { %v2187_v59 = vadd.f32 %v2482_v56, %v2179_v58  ;;  %v2172_v60 = vmul.f32 %v2838_v57, %v2156_v42 }
 0xb29   : > { %v2496_v61 = vpack.c.bf16 %v2187_v59, %v2187_v59  ;;  %v2180_v62 = vmul.f32 %v2481_v54, %v2172_v60 }
 0xb2b   : > { %2198 = vst.msk [vmem:[%s3177_s12] sm:$0xf] %vm2197_vm9, %v2496_v61  ;;  %v2188_v63 = vadd.f32 %v2482_v56, %v2180_v62 }
 0xb2d   : > { %v2497_v1 = vpack.c.bf16 %v2188_v63, %v2188_v63 }
 0xb2f   : > { %2199 = vst.msk [vmem:[%s3177_s12 + $0x4] sm:$0xf] %vm2197_vm9, %v2497_v1 }
 0xb30 PF: > { %s3643_s21 = sld [smem:[#allocation11_spill]]  ;;  %s3644_s0 = sld [smem:[#allocation8_spill]] }
 0xb31   : > { %s3646_s26 = sld [smem:[#allocation31_spill]]  ;;  %s2214_s23 = sshll.u32 %s3177_s12, 4  ;;  %s3502_s23 = int_to_ptr.vmem [resolvable:$true] %s2214_s23 }
 0xb32   : > { %s2839_s18 = scalar_lea.vmem %s3502_s23, 128  ;;  %s2951_s25 = smov [#allocation4]  }
 0xb33   : > { %p2840_p2 = scmp.ne.s32.totalorder %s3502_s23, %s2839_s18  ;;  %s2843_s4 = sshll.u32 %s2951_s25, 4  ;;  %s2844_s4 = int_to_ptr.vmem [resolvable:$false] %s2843_s4 }
 0xb34   : > { %s2845_s8 = scalar_lea.vmem %s2844_s4, 256  ;;  %p2846_p6 = scmp.lt.s32.totalorder %s3502_s23, %s2844_s4 }
 0xb35   : > { %p2841_p4 = pnand %p2840_p2, %p3087_p3  ;;  %p2847_p7 = scmp.lt.s32.totalorder %s2845_s8, %s2839_s18 }
 0xb36   : > { %s2498_s28 = sshll.u32 %s3643_s21, 7  ;;  %s3648_s16 = sand.u32 1, %s3644_s0  }
 0xb37   : > { %s3647_s17 = smov %s3646_s26  ;;  %s3499_s27 = scalar_lea.hbm %s3646_s26, %s2498_s28 }
 0xb38   : > { %s3506_s22 = scalar_lea.sflag [#allocation5], %s3648_s16  ;;  %p2842_p5 = pneg %p2841_p4 }
 0xb39   : > { %p2848_p8 = por %p2847_p7, %p2846_p6 }
 0xb3b   : > { %p2849_p10 = pnand %p2848_p8, %p2842_p5 }
 0xb3d   : > { %2852 = shalt.err (!%p2849_p10)
}
 0xb3e   : > { %s2853_s12 = scalar_lea.hbm %s3499_s27, 128  ;;  %s2857_s7 = scalar_lea.hbm %s3647_s17, 256 }
 0xb3f   : > { %p2854_p11 = scmp.ne.s32.totalorder %s3499_s27, %s2853_s12  ;;  %p2858_p0 = scmp.lt.u32.totalorder %s3499_s27, %s3647_s17 }
 0xb40   : > { %p2859_p1 = scmp.lt.u32.totalorder %s2857_s7, %s2853_s12  ;;  %p2861_p4 = scmp.lt.u32.totalorder %s2853_s12, %s3499_s27 }
 0xb41   : > { %p2855_p12 = pnand %p2854_p11, %p3087_p3 }
 0xb42   : > { %p2860_p2 = por %p2859_p1, %p2858_p0 }
 0xb43   : > { %p2856_p13 = pneg %p2855_p12 }
 0xb44   : > { %p2862_p5 = por %p2861_p4, %p2860_p2 }
 0xb46   : > { %p2863_p6 = pnand %p2862_p5, %p2856_p13 }
 0xb48   : > { %2866 = shalt.err (!%p2863_p6)
}
 0xb49   : > { %s2952_s11 = smov 4  }
 0xb4a   : > { %2689 = dma.vmem_to_hbm [thread:$0]  (%p3087_p3), %s3502_s23, 128, %s3499_s27, %s3506_s22, %s2944_s13, %s2944_s13, %s2952_s11  }
 0xb4b PF: > { %s3649_s30 = sld [smem:[#allocation14_spill]]  ;;  %s3650_s14 = sld [smem:[#allocation7_spill]] }
 0xb51   : > { %p2695_p7 = scmp.ge.s32.totalorder %s3649_s30, 2  ;;  %s2229_s0 = sand.u32 1, %s3650_s14  }
 0xb52   : > { %s2230_s28 = scalar_lea.sflag [#allocation5], %s2229_s0 }
 0xb53   : > { %p2692_p8 = pnand %p2695_p7, %p3097_p9 }
 0xb55   : > { %2900 = dma.done.wait (!%p2692_p8), %s2230_s28, 128  }
 0xb56   : > { %2902 = vsyncadd (!%p2692_p8), %s2230_s28, 4294967168  ;;  %s29_s28 = sadd.s32 1, %s3649_s30   ;;  %s3652_s21 = sld [smem:[#allocation8_spill]] }
 0xb57   : > { %p26_p10 = scmp.ge.s32.totalorder %s29_s28, 6   ;;  %s3653_s22 = sld [smem:[#allocation9_spill]] }
 0xb58   : > { %s3654_s23 = sld [smem:[#allocation19_spill]]  ;;  %s3655_s24 = sld [smem:[#allocation12_spill]] }
 0xb59   : > { %s3656_s25 = sld [smem:[#allocation13_spill]]  ;;  %s3657_s26 = sld [smem:[#allocation15_spill]] }
 0xb5a   : > { %s3658_s27 = sld [smem:[#allocation17_spill]]  ;;  %28 = sbr.rel (!%p26_p10) target bundleno = 18 (0x12), region = 168 }
 0xb61   :  { %2235 = vsyncpa [#allocation5], 1 }
 0xb62   :  { %2237 = vsyncpa [#allocation5 + $0x1], 1 }

</bundles_post_ra>
